<compile_context>
chip_gen: v6e
topology: v6e:2x2x1
jax: 0.10.0
libtpu: 0.0.40
codegen_flags: <defaults>
</compile_context>

<pallas_src>
import functools

import jax
import jax.numpy as jnp
from jax.experimental import pallas as pl
from jax.experimental.pallas import tpu as pltpu

# ----------------------------- configuration --------------------------------
Z_DIM = 8
JOINT_DIM = 7
HIDDEN = 32
NUM_LAYERS = 2
INPUT_SIZE = 2 * Z_DIM + JOINT_DIM     # concat([z_i_t, z_i_g, j_pre], dim=2) = 23
B = 2
T = 8
DTYPE = jnp.float32

# lane-aligned segment layout for the merged head layer-1 output
SEG = 384                               # 288 (mean / log_var hidden) padded to 3*128
JOFF = 2 * SEG                          # joint hidden segment starts at 768
H1_TOTAL = 1024                         # 288p | 288p | 160p  -> 1024 lanes
OUT_LANES = 128                         # packed output: [mean(8) | log_var(8) | joint(7) | pad]


# ------------------------------ fused kernel ---------------------------------
def _fused_kernel(t_steps, batch,
                  x_ref, wx0_ref, b0_ref, wr0_ref, whh1_ref, b1_ref,
                  wh1_ref, bh1_ref, w2_ref, b2_ref, jmask_ref, w3_ref, b3_ref,
                  out_ref):
    H = HIDDEN
    f32 = jnp.float32

    # ---- off-critical-path precompute: layer-0 input projections for all t ----
    # (T*B, 23) @ (23, 4H) + folded bias, one MXU pass for all timesteps.
    xw = jnp.dot(x_ref[...], wx0_ref[...], preferred_element_type=f32) + b0_ref[...]
    xw_t = [xw[t * batch:(t + 1) * batch, :] for t in range(t_steps)]   # hoisted slices

    # hoisted bias broadcast (JAX does not CSE broadcast_in_dim)
    b1f = jnp.broadcast_to(b1_ref[...], (batch, 4 * H))
    wr0 = wr0_ref[...]        # (H, 8H)  = [Whh0 | Wih1]
    whh1 = whh1_ref[...]      # (H, 4H)

    def lstm_update(gates, c_prev):
        # full-vreg EUP activations, then gate slices (PyTorch order i, f, g, o)
        sig = jax.nn.sigmoid(gates)
        tnh = jnp.tanh(gates)
        i_g = sig[:, 0 * H:1 * H]
        f_g = sig[:, 1 * H:2 * H]
        g_g = tnh[:, 2 * H:3 * H]
        o_g = sig[:, 3 * H:4 * H]
        c_new = f_g * c_prev + i_g * g_g
        h_new = o_g * jnp.tanh(c_new)
        return h_new, c_new

    h0 = jnp.zeros((batch, H), f32)
    c0 = jnp.zeros((batch, H), f32)
    h1 = jnp.zeros((batch, H), f32)
    c1 = jnp.zeros((batch, H), f32)

    hs = []
    # Wavefront schedule: step s runs layer-0 time s and layer-1 time s-1.
    # The two matmuls of a step only read state from step s-1 -> independent.
    for s in range(t_steps + 1):
        run0 = s < t_steps
        run1 = s >= 1
        if s == 0:
            # h0 == 0: recurrent term vanishes, no dot needed.
            h0, c0 = lstm_update(xw_t[0], c0)
            continue
        # one shared dot: h0 @ [Whh0 | Wih1]  -> (B, 8H)
        g01 = jnp.dot(h0, wr0, preferred_element_type=f32)
        if run1:
            g1 = g01[:, 4 * H:] + b1f
            if s >= 2:               # h1 is still zero at s == 1
                g1 = g1 + jnp.dot(h1, whh1, preferred_element_type=f32)
        if run0:
            g0 = g01[:, :4 * H] + xw_t[s]
        if run1:
            h1, c1 = lstm_update(g1, c1)
            hs.append(h1)            # layer-1 output for time s-1
        if run0:
            h0, c0 = lstm_update(g0, c0)

    # all top-layer hidden states, rows ordered t-major: row = t*batch + b
    xf = jnp.concatenate(hs, axis=0)                               # (T*B, H)

    # ---------------- fused heads ----------------
    # merged layer 1 (mean | log_var | joint, BN1 folded), lane-dense 1024 wide
    h1a = jnp.maximum(
        jnp.dot(xf, wh1_ref[...], preferred_element_type=f32) + bh1_ref[...], 0.0)

    # merged block-diagonal layer 2: cols 0:8 mean, 8:16 log_var, 16:96 joint hidden
    r = jnp.dot(h1a, w2_ref[...], preferred_element_type=f32) + b2_ref[...]  # (N, 128)
    # ReLU only on the joint lanes:  r - mask * min(r, 0)
    r = r - jmask_ref[...] * jnp.minimum(r, 0.0)

    # final layer: identity passthrough of mean/log_var + fused joint lin3·lin4;
    # single unmasked lane-dense 128-wide store.
    out_ref[...] = jnp.dot(r, w3_ref[...], preferred_element_type=f32) + b3_ref[...]


# ------------------------------ wrapper ---------------------------------------
def lstm_module_forward(z_i_t, z_i_g, j_pre, kernel_params):
    """Full LSTM_ forward. Inputs: z_i_t (B,T*Z), z_i_g (B,T*Z), j_pre (B,T*J)."""
    B_ = j_pre.shape[0]
    T_ = z_i_t.shape[1] // Z_DIM
    N = T_ * B_

    # layout plumbing (tiny): build the concatenated, t-major input rows once.
    zt = z_i_t.reshape(B_, T_, Z_DIM)
    zg = z_i_g.reshape(B_, T_, Z_DIM)
    jp = j_pre.reshape(B_, T_, JOINT_DIM)
    x = jnp.concatenate([zt, zg, jp], axis=2)                      # (B, T, 23)
    x_tm = jnp.transpose(x, (1, 0, 2)).reshape(N, INPUT_SIZE)      # row = t*B + b

    vmem_spec = pl.BlockSpec(memory_space=pltpu.MemorySpace.VMEM)
    n_in = 1 + len(kernel_params)

    packed = pl.pallas_call(
        functools.partial(_fused_kernel, T_, B_),
        out_shape=jax.ShapeDtypeStruct((N, OUT_LANES), DTYPE),
        in_specs=[vmem_spec] * n_in,
        out_specs=vmem_spec,
        cost_estimate=pl.CostEstimate(flops=7_000_000,
                                      transcendentals=10_000,
                                      bytes_accessed=850_000),
    )(x_tm, *kernel_params)

    p = jnp.transpose(packed.reshape(T_, B_, OUT_LANES), (1, 0, 2))   # (B, T, 128)
    mean = p[..., 0:Z_DIM]
    log_var = p[..., Z_DIM:2 * Z_DIM]
    j_next = p[..., 2 * Z_DIM:2 * Z_DIM + JOINT_DIM]
    return mean, log_var, j_next


# --------------------------- parameter creation -------------------------------
def make_raw_params(key):
    """Raw parameters mirroring the PyTorch module layout."""
    keys = iter(jax.random.split(key, 64))

    def rnd(shape, scale=0.1):
        return (scale * jax.random.normal(next(keys), shape)).astype(DTYPE)

    lstm = []
    for l in range(NUM_LAYERS):
        in_l = INPUT_SIZE if l == 0 else HIDDEN
        lstm.append(dict(w_ih=rnd((4 * HIDDEN, in_l)),
                         w_hh=rnd((4 * HIDDEN, HIDDEN)),
                         b_ih=rnd((4 * HIDDEN,)),
                         b_hh=rnd((4 * HIDDEN,))))

    def lin(in_d, out_d):
        return dict(w=rnd((out_d, in_d)), b=rnd((out_d,)))

    def bn(n):
        return dict(gamma=(1.0 + rnd((n,))).astype(DTYPE),
                    beta=rnd((n,)),
                    mean=rnd((n,)),
                    var=(jnp.abs(rnd((n,))) + 1.0).astype(DTYPE))

    return dict(
        lstm=lstm,
        mean=[lin(HIDDEN, 288), lin(288, Z_DIM)],
        log_var=[lin(HIDDEN, 288), lin(288, Z_DIM)],
        joint=dict(lin1=lin(HIDDEN, 160), bn1=bn(160),
                   lin2=lin(160, 80), bn2=bn(80),
                   lin3=lin(80, 30), lin4=lin(30, JOINT_DIM)),
    )


def _bn_affine(p, eps=1e-5):
    s = p["gamma"] / jnp.sqrt(p["var"] + eps)
    t = p["beta"] - p["mean"] * s
    return s.astype(DTYPE), t.astype(DTYPE)


def prepare_kernel_params(raw):
    """Host-side folding / merging / lane-padding of the raw parameters."""
    l0, l1 = raw["lstm"]

    # Layer-0 input weights (hoisted out of the recurrence) + combined bias.
    WX0 = l0["w_ih"].T.astype(DTYPE)                                    # (23, 128)
    B0 = (l0["b_ih"] + l0["b_hh"]).reshape(1, -1).astype(DTYPE)         # (1, 128)
    # Shared recurrent dot weight: h0 @ [Whh0 | Wih1]  -> (32, 256).
    WR0 = jnp.concatenate([l0["w_hh"].T, l1["w_ih"].T], axis=1).astype(DTYPE)
    WHH1 = l1["w_hh"].T.astype(DTYPE)                                   # (32, 128)
    B1 = (l1["b_ih"] + l1["b_hh"]).reshape(1, -1).astype(DTYPE)         # (1, 128)

    wm1, bm1 = raw["mean"][0]["w"].T, raw["mean"][0]["b"]               # (32,288),(288,)
    wm2, bm2 = raw["mean"][1]["w"].T, raw["mean"][1]["b"]               # (288,8),(8,)
    wv1, bv1 = raw["log_var"][0]["w"].T, raw["log_var"][0]["b"]
    wv2, bv2 = raw["log_var"][1]["w"].T, raw["log_var"][1]["b"]
    j = raw["joint"]
    wj1, bj1 = j["lin1"]["w"].T, j["lin1"]["b"]                         # (32,160),(160,)
    wj2, bj2 = j["lin2"]["w"].T, j["lin2"]["b"]                         # (160,80),(80,)
    wj3, bj3 = j["lin3"]["w"].T, j["lin3"]["b"]                         # (80,30),(30,)
    wj4, bj4 = j["lin4"]["w"].T, j["lin4"]["b"]                         # (30,7),(7,)
    s1, t1 = _bn_affine(j["bn1"])
    s2, t2 = _bn_affine(j["bn2"])

    # Fold eval-mode BN into adjacent joint linears.
    wj1f, bj1f = wj1 * s1[None, :], bj1 * s1 + t1
    wj2f, bj2f = wj2 * s2[None, :], bj2 * s2 + t2
    # Fuse joint lin3 · lin4 (no activation between them).
    wj34 = (wj3 @ wj4).astype(DTYPE)                                    # (80, 7)
    bj34 = (bj3 @ wj4 + bj4).astype(DTYPE)                              # (7,)

    # Merged, lane-aligned head layer 1: (32, 1024).
    WH1 = jnp.zeros((HIDDEN, H1_TOTAL), DTYPE)
    WH1 = WH1.at[:, 0:288].set(wm1)
    WH1 = WH1.at[:, SEG:SEG + 288].set(wv1)
    WH1 = WH1.at[:, JOFF:JOFF + 160].set(wj1f)
    BH1 = jnp.zeros((1, H1_TOTAL), DTYPE)
    BH1 = BH1.at[0, 0:288].set(bm1)
    BH1 = BH1.at[0, SEG:SEG + 288].set(bv1)
    BH1 = BH1.at[0, JOFF:JOFF + 160].set(bj1f)

    # Merged block-diagonal second layer: (1024, 128).
    # cols 0:8 mean, 8:16 log_var, 16:96 joint hidden (pre-ReLU), rest 0.
    W2 = jnp.zeros((H1_TOTAL, OUT_LANES), DTYPE)
    W2 = W2.at[0:288, 0:Z_DIM].set(wm2)
    W2 = W2.at[SEG:SEG + 288, Z_DIM:2 * Z_DIM].set(wv2)
    W2 = W2.at[JOFF:JOFF + 160, 16:96].set(wj2f)
    B2 = jnp.zeros((1, OUT_LANES), DTYPE)
    B2 = B2.at[0, 0:Z_DIM].set(bm2)
    B2 = B2.at[0, Z_DIM:2 * Z_DIM].set(bv2)
    B2 = B2.at[0, 16:96].set(bj2f)

    # ReLU mask over the joint lanes only.
    JMASK = jnp.zeros((1, OUT_LANES), DTYPE).at[0, 16:96].set(1.0)

    # Final layer: identity passthrough of mean/log_var + fused joint lin3·4.
    W3 = jnp.zeros((OUT_LANES, OUT_LANES), DTYPE)
    W3 = W3.at[0:16, 0:16].set(jnp.eye(16, dtype=DTYPE))
    W3 = W3.at[16:96, 16:16 + JOINT_DIM].set(wj34)
    B3 = jnp.zeros((1, OUT_LANES), DTYPE).at[0, 16:16 + JOINT_DIM].set(bj34)

    return (WX0, B0, WR0, WHH1, B1, WH1, BH1, W2, B2, JMASK, W3, B3)


# ----------------------------- pure-JAX reference -----------------------------
def _reference_forward(z_i_t, z_i_g, j_pre, raw):
    B_ = j_pre.shape[0]
    z_t = z_i_t.reshape(B_, -1, Z_DIM)
    z_g = z_i_g.reshape(B_, -1, Z_DIM)
    j_p = j_pre.reshape(B_, -1, JOINT_DIM)
    x = jnp.concatenate([z_t, z_g, j_p], axis=2)
    T_ = x.shape[1]
    H = HIDDEN

    h = [jnp.zeros((B_, H), DTYPE) for _ in range(NUM_LAYERS)]
    c = [jnp.zeros((B_, H), DTYPE) for _ in range(NUM_LAYERS)]
    outs = []
    for t in range(T_):
        inp = x[:, t]
        for l in range(NUM_LAYERS):
            lp = raw["lstm"][l]
            gates = inp @ lp["w_ih"].T + h[l] @ lp["w_hh"].T + lp["b_ih"] + lp["b_hh"]
            i_g = jax.nn.sigmoid(gates[:, :H])
            f_g = jax.nn.sigmoid(gates[:, H:2 * H])
            g_g = jnp.tanh(gates[:, 2 * H:3 * H])
            o_g = jax.nn.sigmoid(gates[:, 3 * H:])
            c[l] = f_g * c[l] + i_g * g_g
            h[l] = o_g * jnp.tanh(c[l])
            inp = h[l]
        outs.append(inp)
    hs = jnp.stack(outs, axis=1)                                   # (B, T, H)

    relu = lambda v: jnp.maximum(v, 0.0)
    lin = lambda p, v: v @ p["w"].T + p["b"]
    bn_eval = lambda p, v: (v - p["mean"]) / jnp.sqrt(p["var"] + 1e-5) * p["gamma"] + p["beta"]

    mean = lin(raw["mean"][1], relu(lin(raw["mean"][0], hs)))
    logv = lin(raw["log_var"][1], relu(lin(raw["log_var"][0], hs)))

    xf = hs.reshape(-1, H)
    jt = raw["joint"]
    v = relu(bn_eval(jt["bn1"], lin(jt["lin1"], xf)))
    v = relu(bn_eval(jt["bn2"], lin(jt["lin2"], v)))
    v = lin(jt["lin4"], lin(jt["lin3"], v))
    return mean, logv, v.reshape(B_, T_, JOINT_DIM)


# ---------------------------------- main ---------------------------------------
if __name__ == "__main__":
    key = jax.random.PRNGKey(0)
    k_p, k1, k2, k3 = jax.random.split(key, 4)

    raw_params = make_raw_params(k_p)
    kernel_params = prepare_kernel_params(raw_params)

    z_i_t = jax.random.normal(k1, (B, T * Z_DIM), DTYPE)
    z_i_g = jax.random.normal(k2, (B, T * Z_DIM), DTYPE)
    j_pre = jax.random.normal(k3, (B, T * JOINT_DIM), DTYPE)

    fwd = jax.jit(lstm_module_forward)
    mean, log_var, j_next = jax.block_until_ready(
        fwd(z_i_t, z_i_g, j_pre, kernel_params))

    mean_r, log_var_r, j_next_r = _reference_forward(z_i_t, z_i_g, j_pre, raw_params)

    assert mean.shape == (B, T, Z_DIM)
    assert log_var.shape == (B, T, Z_DIM)
    assert j_next.shape == (B, T, JOINT_DIM)
    assert jnp.allclose(mean, mean_r, rtol=1e-3, atol=1e-3), \
        float(jnp.max(jnp.abs(mean - mean_r)))
    assert jnp.allclose(log_var, log_var_r, rtol=1e-3, atol=1e-3), \
        float(jnp.max(jnp.abs(log_var - log_var_r)))
    assert jnp.allclose(j_next, j_next_r, rtol=1e-3, atol=1e-3), \
        float(jnp.max(jnp.abs(j_next - j_next_r)))

    print("KERNEL_OK")
</pallas_src>

<mosaic_0001>
module attributes {stable_mosaic.version = 11 : i64} {
  func.func @_fused_kernel(%arg0: memref<16x23xf32, #tpu.memory_space<vmem>>, %arg1: memref<23x128xf32, #tpu.memory_space<vmem>>, %arg2: memref<1x128xf32, #tpu.memory_space<vmem>>, %arg3: memref<32x256xf32, #tpu.memory_space<vmem>>, %arg4: memref<32x128xf32, #tpu.memory_space<vmem>>, %arg5: memref<1x128xf32, #tpu.memory_space<vmem>>, %arg6: memref<32x1024xf32, #tpu.memory_space<vmem>>, %arg7: memref<1x1024xf32, #tpu.memory_space<vmem>>, %arg8: memref<1024x128xf32, #tpu.memory_space<vmem>>, %arg9: memref<1x128xf32, #tpu.memory_space<vmem>>, %arg10: memref<1x128xf32, #tpu.memory_space<vmem>>, %arg11: memref<128x128xf32, #tpu.memory_space<vmem>>, %arg12: memref<1x128xf32, #tpu.memory_space<vmem>>, %arg13: memref<16x128xf32, #tpu.memory_space<vmem>>) attributes {dimension_semantics = [], scalar_prefetch = 0 : i64, scratch_operands = 0 : i64, tpu.core_type = #tpu.core_type<tc>} {
    %c0 = arith.constant 0 : index
    %c0_0 = arith.constant 0 : index
    %0 = vector.load %arg0[%c0, %c0_0] : memref<16x23xf32, #tpu.memory_space<vmem>>, vector<16x23xf32>
    %c0_1 = arith.constant 0 : index
    %c0_2 = arith.constant 0 : index
    %1 = vector.load %arg1[%c0_1, %c0_2] : memref<23x128xf32, #tpu.memory_space<vmem>>, vector<23x128xf32>
    %cst = arith.constant dense<0.000000e+00> : vector<16x128xf32>
    %2 = tpu.matmul %0, %1, %cst {dimension_numbers = #tpu.dot_dimension_numbers<[1], [0], [0], [1], [0, 0, 1, 1], [], []>} : vector<16x23xf32>, vector<23x128xf32>, vector<16x128xf32> -> vector<16x128xf32>
    %c0_3 = arith.constant 0 : index
    %c0_4 = arith.constant 0 : index
    %3 = vector.load %arg2[%c0_3, %c0_4] : memref<1x128xf32, #tpu.memory_space<vmem>>, vector<1x128xf32>
    %4 = vector.broadcast %3 : vector<1x128xf32> to vector<16x128xf32>
    %5 = arith.addf %2, %4 : vector<16x128xf32>
    %6 = vector.extract_strided_slice %5 {offsets = [0, 0], sizes = [2, 128], strides = [1, 1]} : vector<16x128xf32> to vector<2x128xf32>
    %7 = vector.extract_strided_slice %5 {offsets = [2, 0], sizes = [2, 128], strides = [1, 1]} : vector<16x128xf32> to vector<2x128xf32>
    %8 = vector.extract_strided_slice %5 {offsets = [4, 0], sizes = [2, 128], strides = [1, 1]} : vector<16x128xf32> to vector<2x128xf32>
    %9 = vector.extract_strided_slice %5 {offsets = [6, 0], sizes = [2, 128], strides = [1, 1]} : vector<16x128xf32> to vector<2x128xf32>
    %10 = vector.extract_strided_slice %5 {offsets = [8, 0], sizes = [2, 128], strides = [1, 1]} : vector<16x128xf32> to vector<2x128xf32>
    %11 = vector.extract_strided_slice %5 {offsets = [10, 0], sizes = [2, 128], strides = [1, 1]} : vector<16x128xf32> to vector<2x128xf32>
    %12 = vector.extract_strided_slice %5 {offsets = [12, 0], sizes = [2, 128], strides = [1, 1]} : vector<16x128xf32> to vector<2x128xf32>
    %13 = vector.extract_strided_slice %5 {offsets = [14, 0], sizes = [2, 128], strides = [1, 1]} : vector<16x128xf32> to vector<2x128xf32>
    %c0_5 = arith.constant 0 : index
    %c0_6 = arith.constant 0 : index
    %14 = vector.load %arg5[%c0_5, %c0_6] : memref<1x128xf32, #tpu.memory_space<vmem>>, vector<1x128xf32>
    %15 = vector.shape_cast %14 : vector<1x128xf32> to vector<1x128xf32>
    %16 = vector.broadcast %15 : vector<1x128xf32> to vector<2x128xf32>
    %c0_7 = arith.constant 0 : index
    %c0_8 = arith.constant 0 : index
    %17 = vector.load %arg3[%c0_7, %c0_8] : memref<32x256xf32, #tpu.memory_space<vmem>>, vector<32x256xf32>
    %c0_9 = arith.constant 0 : index
    %c0_10 = arith.constant 0 : index
    %18 = vector.load %arg4[%c0_9, %c0_10] : memref<32x128xf32, #tpu.memory_space<vmem>>, vector<32x128xf32>
    %cst_11 = arith.constant 0.000000e+00 : f32
    %19 = vector.broadcast %cst_11 : f32 to vector<2x32xf32>
    %cst_12 = arith.constant 0.000000e+00 : f32
    %20 = vector.broadcast %cst_12 : f32 to vector<2x32xf32>
    %21 = arith.negf %6 : vector<2x128xf32>
    %22 = math.exp %21 : vector<2x128xf32>
    %cst_13 = arith.constant 1.000000e+00 : f32
    %23 = vector.broadcast %cst_13 : f32 to vector<2x128xf32>
    %24 = arith.addf %23, %22 : vector<2x128xf32>
    %25 = arith.divf %23, %24 : vector<2x128xf32>
    %26 = math.tanh %6 : vector<2x128xf32>
    %27 = vector.extract_strided_slice %25 {offsets = [0, 0], sizes = [2, 32], strides = [1, 1]} : vector<2x128xf32> to vector<2x32xf32>
    %28 = vector.extract_strided_slice %25 {offsets = [0, 32], sizes = [2, 32], strides = [1, 1]} : vector<2x128xf32> to vector<2x32xf32>
    %29 = vector.extract_strided_slice %26 {offsets = [0, 64], sizes = [2, 32], strides = [1, 1]} : vector<2x128xf32> to vector<2x32xf32>
    %30 = vector.extract_strided_slice %25 {offsets = [0, 96], sizes = [2, 32], strides = [1, 1]} : vector<2x128xf32> to vector<2x32xf32>
    %31 = arith.mulf %28, %19 : vector<2x32xf32>
    %32 = arith.mulf %27, %29 : vector<2x32xf32>
    %33 = arith.addf %31, %32 : vector<2x32xf32>
    %34 = math.tanh %33 : vector<2x32xf32>
    %35 = arith.mulf %30, %34 : vector<2x32xf32>
    %cst_14 = arith.constant dense<0.000000e+00> : vector<2x256xf32>
    %36 = tpu.matmul %35, %17, %cst_14 {dimension_numbers = #tpu.dot_dimension_numbers<[1], [0], [0], [1], [0, 0, 1, 1], [], []>} : vector<2x32xf32>, vector<32x256xf32>, vector<2x256xf32> -> vector<2x256xf32>
    %37 = vector.extract_strided_slice %36 {offsets = [0, 128], sizes = [2, 128], strides = [1, 1]} : vector<2x256xf32> to vector<2x128xf32>
    %38 = arith.addf %37, %16 : vector<2x128xf32>
    %39 = vector.extract_strided_slice %36 {offsets = [0, 0], sizes = [2, 128], strides = [1, 1]} : vector<2x256xf32> to vector<2x128xf32>
    %40 = arith.addf %39, %7 : vector<2x128xf32>
    %41 = arith.negf %38 : vector<2x128xf32>
    %42 = math.exp %41 : vector<2x128xf32>
    %cst_15 = arith.constant 1.000000e+00 : f32
    %43 = vector.broadcast %cst_15 : f32 to vector<2x128xf32>
    %44 = arith.addf %43, %42 : vector<2x128xf32>
    %45 = arith.divf %43, %44 : vector<2x128xf32>
    %46 = math.tanh %38 : vector<2x128xf32>
    %47 = vector.extract_strided_slice %45 {offsets = [0, 0], sizes = [2, 32], strides = [1, 1]} : vector<2x128xf32> to vector<2x32xf32>
    %48 = vector.extract_strided_slice %45 {offsets = [0, 32], sizes = [2, 32], strides = [1, 1]} : vector<2x128xf32> to vector<2x32xf32>
    %49 = vector.extract_strided_slice %46 {offsets = [0, 64], sizes = [2, 32], strides = [1, 1]} : vector<2x128xf32> to vector<2x32xf32>
    %50 = vector.extract_strided_slice %45 {offsets = [0, 96], sizes = [2, 32], strides = [1, 1]} : vector<2x128xf32> to vector<2x32xf32>
    %51 = arith.mulf %48, %20 : vector<2x32xf32>
    %52 = arith.mulf %47, %49 : vector<2x32xf32>
    %53 = arith.addf %51, %52 : vector<2x32xf32>
    %54 = math.tanh %53 : vector<2x32xf32>
    %55 = arith.mulf %50, %54 : vector<2x32xf32>
    %56 = arith.negf %40 : vector<2x128xf32>
    %57 = math.exp %56 : vector<2x128xf32>
    %cst_16 = arith.constant 1.000000e+00 : f32
    %58 = vector.broadcast %cst_16 : f32 to vector<2x128xf32>
    %59 = arith.addf %58, %57 : vector<2x128xf32>
    %60 = arith.divf %58, %59 : vector<2x128xf32>
    %61 = math.tanh %40 : vector<2x128xf32>
    %62 = vector.extract_strided_slice %60 {offsets = [0, 0], sizes = [2, 32], strides = [1, 1]} : vector<2x128xf32> to vector<2x32xf32>
    %63 = vector.extract_strided_slice %60 {offsets = [0, 32], sizes = [2, 32], strides = [1, 1]} : vector<2x128xf32> to vector<2x32xf32>
    %64 = vector.extract_strided_slice %61 {offsets = [0, 64], sizes = [2, 32], strides = [1, 1]} : vector<2x128xf32> to vector<2x32xf32>
    %65 = vector.extract_strided_slice %60 {offsets = [0, 96], sizes = [2, 32], strides = [1, 1]} : vector<2x128xf32> to vector<2x32xf32>
    %66 = arith.mulf %63, %33 : vector<2x32xf32>
    %67 = arith.mulf %62, %64 : vector<2x32xf32>
    %68 = arith.addf %66, %67 : vector<2x32xf32>
    %69 = math.tanh %68 : vector<2x32xf32>
    %70 = arith.mulf %65, %69 : vector<2x32xf32>
    %cst_17 = arith.constant dense<0.000000e+00> : vector<2x256xf32>
    %71 = tpu.matmul %70, %17, %cst_17 {dimension_numbers = #tpu.dot_dimension_numbers<[1], [0], [0], [1], [0, 0, 1, 1], [], []>} : vector<2x32xf32>, vector<32x256xf32>, vector<2x256xf32> -> vector<2x256xf32>
    %72 = vector.extract_strided_slice %71 {offsets = [0, 128], sizes = [2, 128], strides = [1, 1]} : vector<2x256xf32> to vector<2x128xf32>
    %73 = arith.addf %72, %16 : vector<2x128xf32>
    %cst_18 = arith.constant dense<0.000000e+00> : vector<2x128xf32>
    %74 = tpu.matmul %55, %18, %cst_18 {dimension_numbers = #tpu.dot_dimension_numbers<[1], [0], [0], [1], [0, 0, 1, 1], [], []>} : vector<2x32xf32>, vector<32x128xf32>, vector<2x128xf32> -> vector<2x128xf32>
    %75 = arith.addf %73, %74 : vector<2x128xf32>
    %76 = vector.extract_strided_slice %71 {offsets = [0, 0], sizes = [2, 128], strides = [1, 1]} : vector<2x256xf32> to vector<2x128xf32>
    %77 = arith.addf %76, %8 : vector<2x128xf32>
    %78 = arith.negf %75 : vector<2x128xf32>
    %79 = math.exp %78 : vector<2x128xf32>
    %cst_19 = arith.constant 1.000000e+00 : f32
    %80 = vector.broadcast %cst_19 : f32 to vector<2x128xf32>
    %81 = arith.addf %80, %79 : vector<2x128xf32>
    %82 = arith.divf %80, %81 : vector<2x128xf32>
    %83 = math.tanh %75 : vector<2x128xf32>
    %84 = vector.extract_strided_slice %82 {offsets = [0, 0], sizes = [2, 32], strides = [1, 1]} : vector<2x128xf32> to vector<2x32xf32>
    %85 = vector.extract_strided_slice %82 {offsets = [0, 32], sizes = [2, 32], strides = [1, 1]} : vector<2x128xf32> to vector<2x32xf32>
    %86 = vector.extract_strided_slice %83 {offsets = [0, 64], sizes = [2, 32], strides = [1, 1]} : vector<2x128xf32> to vector<2x32xf32>
    %87 = vector.extract_strided_slice %82 {offsets = [0, 96], sizes = [2, 32], strides = [1, 1]} : vector<2x128xf32> to vector<2x32xf32>
    %88 = arith.mulf %85, %53 : vector<2x32xf32>
    %89 = arith.mulf %84, %86 : vector<2x32xf32>
    %90 = arith.addf %88, %89 : vector<2x32xf32>
    %91 = math.tanh %90 : vector<2x32xf32>
    %92 = arith.mulf %87, %91 : vector<2x32xf32>
    %93 = arith.negf %77 : vector<2x128xf32>
    %94 = math.exp %93 : vector<2x128xf32>
    %cst_20 = arith.constant 1.000000e+00 : f32
    %95 = vector.broadcast %cst_20 : f32 to vector<2x128xf32>
    %96 = arith.addf %95, %94 : vector<2x128xf32>
    %97 = arith.divf %95, %96 : vector<2x128xf32>
    %98 = math.tanh %77 : vector<2x128xf32>
    %99 = vector.extract_strided_slice %97 {offsets = [0, 0], sizes = [2, 32], strides = [1, 1]} : vector<2x128xf32> to vector<2x32xf32>
    %100 = vector.extract_strided_slice %97 {offsets = [0, 32], sizes = [2, 32], strides = [1, 1]} : vector<2x128xf32> to vector<2x32xf32>
    %101 = vector.extract_strided_slice %98 {offsets = [0, 64], sizes = [2, 32], strides = [1, 1]} : vector<2x128xf32> to vector<2x32xf32>
    %102 = vector.extract_strided_slice %97 {offsets = [0, 96], sizes = [2, 32], strides = [1, 1]} : vector<2x128xf32> to vector<2x32xf32>
    %103 = arith.mulf %100, %68 : vector<2x32xf32>
    %104 = arith.mulf %99, %101 : vector<2x32xf32>
    %105 = arith.addf %103, %104 : vector<2x32xf32>
    %106 = math.tanh %105 : vector<2x32xf32>
    %107 = arith.mulf %102, %106 : vector<2x32xf32>
    %cst_21 = arith.constant dense<0.000000e+00> : vector<2x256xf32>
    %108 = tpu.matmul %107, %17, %cst_21 {dimension_numbers = #tpu.dot_dimension_numbers<[1], [0], [0], [1], [0, 0, 1, 1], [], []>} : vector<2x32xf32>, vector<32x256xf32>, vector<2x256xf32> -> vector<2x256xf32>
    %109 = vector.extract_strided_slice %108 {offsets = [0, 128], sizes = [2, 128], strides = [1, 1]} : vector<2x256xf32> to vector<2x128xf32>
    %110 = arith.addf %109, %16 : vector<2x128xf32>
    %cst_22 = arith.constant dense<0.000000e+00> : vector<2x128xf32>
    %111 = tpu.matmul %92, %18, %cst_22 {dimension_numbers = #tpu.dot_dimension_numbers<[1], [0], [0], [1], [0, 0, 1, 1], [], []>} : vector<2x32xf32>, vector<32x128xf32>, vector<2x128xf32> -> vector<2x128xf32>
    %112 = arith.addf %110, %111 : vector<2x128xf32>
    %113 = vector.extract_strided_slice %108 {offsets = [0, 0], sizes = [2, 128], strides = [1, 1]} : vector<2x256xf32> to vector<2x128xf32>
    %114 = arith.addf %113, %9 : vector<2x128xf32>
    %115 = arith.negf %112 : vector<2x128xf32>
    %116 = math.exp %115 : vector<2x128xf32>
    %cst_23 = arith.constant 1.000000e+00 : f32
    %117 = vector.broadcast %cst_23 : f32 to vector<2x128xf32>
    %118 = arith.addf %117, %116 : vector<2x128xf32>
    %119 = arith.divf %117, %118 : vector<2x128xf32>
    %120 = math.tanh %112 : vector<2x128xf32>
    %121 = vector.extract_strided_slice %119 {offsets = [0, 0], sizes = [2, 32], strides = [1, 1]} : vector<2x128xf32> to vector<2x32xf32>
    %122 = vector.extract_strided_slice %119 {offsets = [0, 32], sizes = [2, 32], strides = [1, 1]} : vector<2x128xf32> to vector<2x32xf32>
    %123 = vector.extract_strided_slice %120 {offsets = [0, 64], sizes = [2, 32], strides = [1, 1]} : vector<2x128xf32> to vector<2x32xf32>
    %124 = vector.extract_strided_slice %119 {offsets = [0, 96], sizes = [2, 32], strides = [1, 1]} : vector<2x128xf32> to vector<2x32xf32>
    %125 = arith.mulf %122, %90 : vector<2x32xf32>
    %126 = arith.mulf %121, %123 : vector<2x32xf32>
    %127 = arith.addf %125, %126 : vector<2x32xf32>
    %128 = math.tanh %127 : vector<2x32xf32>
    %129 = arith.mulf %124, %128 : vector<2x32xf32>
    %130 = arith.negf %114 : vector<2x128xf32>
    %131 = math.exp %130 : vector<2x128xf32>
    %cst_24 = arith.constant 1.000000e+00 : f32
    %132 = vector.broadcast %cst_24 : f32 to vector<2x128xf32>
    %133 = arith.addf %132, %131 : vector<2x128xf32>
    %134 = arith.divf %132, %133 : vector<2x128xf32>
    %135 = math.tanh %114 : vector<2x128xf32>
    %136 = vector.extract_strided_slice %134 {offsets = [0, 0], sizes = [2, 32], strides = [1, 1]} : vector<2x128xf32> to vector<2x32xf32>
    %137 = vector.extract_strided_slice %134 {offsets = [0, 32], sizes = [2, 32], strides = [1, 1]} : vector<2x128xf32> to vector<2x32xf32>
    %138 = vector.extract_strided_slice %135 {offsets = [0, 64], sizes = [2, 32], strides = [1, 1]} : vector<2x128xf32> to vector<2x32xf32>
    %139 = vector.extract_strided_slice %134 {offsets = [0, 96], sizes = [2, 32], strides = [1, 1]} : vector<2x128xf32> to vector<2x32xf32>
    %140 = arith.mulf %137, %105 : vector<2x32xf32>
    %141 = arith.mulf %136, %138 : vector<2x32xf32>
    %142 = arith.addf %140, %141 : vector<2x32xf32>
    %143 = math.tanh %142 : vector<2x32xf32>
    %144 = arith.mulf %139, %143 : vector<2x32xf32>
    %cst_25 = arith.constant dense<0.000000e+00> : vector<2x256xf32>
    %145 = tpu.matmul %144, %17, %cst_25 {dimension_numbers = #tpu.dot_dimension_numbers<[1], [0], [0], [1], [0, 0, 1, 1], [], []>} : vector<2x32xf32>, vector<32x256xf32>, vector<2x256xf32> -> vector<2x256xf32>
    %146 = vector.extract_strided_slice %145 {offsets = [0, 128], sizes = [2, 128], strides = [1, 1]} : vector<2x256xf32> to vector<2x128xf32>
    %147 = arith.addf %146, %16 : vector<2x128xf32>
    %cst_26 = arith.constant dense<0.000000e+00> : vector<2x128xf32>
    %148 = tpu.matmul %129, %18, %cst_26 {dimension_numbers = #tpu.dot_dimension_numbers<[1], [0], [0], [1], [0, 0, 1, 1], [], []>} : vector<2x32xf32>, vector<32x128xf32>, vector<2x128xf32> -> vector<2x128xf32>
    %149 = arith.addf %147, %148 : vector<2x128xf32>
    %150 = vector.extract_strided_slice %145 {offsets = [0, 0], sizes = [2, 128], strides = [1, 1]} : vector<2x256xf32> to vector<2x128xf32>
    %151 = arith.addf %150, %10 : vector<2x128xf32>
    %152 = arith.negf %149 : vector<2x128xf32>
    %153 = math.exp %152 : vector<2x128xf32>
    %cst_27 = arith.constant 1.000000e+00 : f32
    %154 = vector.broadcast %cst_27 : f32 to vector<2x128xf32>
    %155 = arith.addf %154, %153 : vector<2x128xf32>
    %156 = arith.divf %154, %155 : vector<2x128xf32>
    %157 = math.tanh %149 : vector<2x128xf32>
    %158 = vector.extract_strided_slice %156 {offsets = [0, 0], sizes = [2, 32], strides = [1, 1]} : vector<2x128xf32> to vector<2x32xf32>
    %159 = vector.extract_strided_slice %156 {offsets = [0, 32], sizes = [2, 32], strides = [1, 1]} : vector<2x128xf32> to vector<2x32xf32>
    %160 = vector.extract_strided_slice %157 {offsets = [0, 64], sizes = [2, 32], strides = [1, 1]} : vector<2x128xf32> to vector<2x32xf32>
    %161 = vector.extract_strided_slice %156 {offsets = [0, 96], sizes = [2, 32], strides = [1, 1]} : vector<2x128xf32> to vector<2x32xf32>
    %162 = arith.mulf %159, %127 : vector<2x32xf32>
    %163 = arith.mulf %158, %160 : vector<2x32xf32>
    %164 = arith.addf %162, %163 : vector<2x32xf32>
    %165 = math.tanh %164 : vector<2x32xf32>
    %166 = arith.mulf %161, %165 : vector<2x32xf32>
    %167 = arith.negf %151 : vector<2x128xf32>
    %168 = math.exp %167 : vector<2x128xf32>
    %cst_28 = arith.constant 1.000000e+00 : f32
    %169 = vector.broadcast %cst_28 : f32 to vector<2x128xf32>
    %170 = arith.addf %169, %168 : vector<2x128xf32>
    %171 = arith.divf %169, %170 : vector<2x128xf32>
    %172 = math.tanh %151 : vector<2x128xf32>
    %173 = vector.extract_strided_slice %171 {offsets = [0, 0], sizes = [2, 32], strides = [1, 1]} : vector<2x128xf32> to vector<2x32xf32>
    %174 = vector.extract_strided_slice %171 {offsets = [0, 32], sizes = [2, 32], strides = [1, 1]} : vector<2x128xf32> to vector<2x32xf32>
    %175 = vector.extract_strided_slice %172 {offsets = [0, 64], sizes = [2, 32], strides = [1, 1]} : vector<2x128xf32> to vector<2x32xf32>
    %176 = vector.extract_strided_slice %171 {offsets = [0, 96], sizes = [2, 32], strides = [1, 1]} : vector<2x128xf32> to vector<2x32xf32>
    %177 = arith.mulf %174, %142 : vector<2x32xf32>
    %178 = arith.mulf %173, %175 : vector<2x32xf32>
    %179 = arith.addf %177, %178 : vector<2x32xf32>
    %180 = math.tanh %179 : vector<2x32xf32>
    %181 = arith.mulf %176, %180 : vector<2x32xf32>
    %cst_29 = arith.constant dense<0.000000e+00> : vector<2x256xf32>
    %182 = tpu.matmul %181, %17, %cst_29 {dimension_numbers = #tpu.dot_dimension_numbers<[1], [0], [0], [1], [0, 0, 1, 1], [], []>} : vector<2x32xf32>, vector<32x256xf32>, vector<2x256xf32> -> vector<2x256xf32>
    %183 = vector.extract_strided_slice %182 {offsets = [0, 128], sizes = [2, 128], strides = [1, 1]} : vector<2x256xf32> to vector<2x128xf32>
    %184 = arith.addf %183, %16 : vector<2x128xf32>
    %cst_30 = arith.constant dense<0.000000e+00> : vector<2x128xf32>
    %185 = tpu.matmul %166, %18, %cst_30 {dimension_numbers = #tpu.dot_dimension_numbers<[1], [0], [0], [1], [0, 0, 1, 1], [], []>} : vector<2x32xf32>, vector<32x128xf32>, vector<2x128xf32> -> vector<2x128xf32>
    %186 = arith.addf %184, %185 : vector<2x128xf32>
    %187 = vector.extract_strided_slice %182 {offsets = [0, 0], sizes = [2, 128], strides = [1, 1]} : vector<2x256xf32> to vector<2x128xf32>
    %188 = arith.addf %187, %11 : vector<2x128xf32>
    %189 = arith.negf %186 : vector<2x128xf32>
    %190 = math.exp %189 : vector<2x128xf32>
    %cst_31 = arith.constant 1.000000e+00 : f32
    %191 = vector.broadcast %cst_31 : f32 to vector<2x128xf32>
    %192 = arith.addf %191, %190 : vector<2x128xf32>
    %193 = arith.divf %191, %192 : vector<2x128xf32>
    %194 = math.tanh %186 : vector<2x128xf32>
    %195 = vector.extract_strided_slice %193 {offsets = [0, 0], sizes = [2, 32], strides = [1, 1]} : vector<2x128xf32> to vector<2x32xf32>
    %196 = vector.extract_strided_slice %193 {offsets = [0, 32], sizes = [2, 32], strides = [1, 1]} : vector<2x128xf32> to vector<2x32xf32>
    %197 = vector.extract_strided_slice %194 {offsets = [0, 64], sizes = [2, 32], strides = [1, 1]} : vector<2x128xf32> to vector<2x32xf32>
    %198 = vector.extract_strided_slice %193 {offsets = [0, 96], sizes = [2, 32], strides = [1, 1]} : vector<2x128xf32> to vector<2x32xf32>
    %199 = arith.mulf %196, %164 : vector<2x32xf32>
    %200 = arith.mulf %195, %197 : vector<2x32xf32>
    %201 = arith.addf %199, %200 : vector<2x32xf32>
    %202 = math.tanh %201 : vector<2x32xf32>
    %203 = arith.mulf %198, %202 : vector<2x32xf32>
    %204 = arith.negf %188 : vector<2x128xf32>
    %205 = math.exp %204 : vector<2x128xf32>
    %cst_32 = arith.constant 1.000000e+00 : f32
    %206 = vector.broadcast %cst_32 : f32 to vector<2x128xf32>
    %207 = arith.addf %206, %205 : vector<2x128xf32>
    %208 = arith.divf %206, %207 : vector<2x128xf32>
    %209 = math.tanh %188 : vector<2x128xf32>
    %210 = vector.extract_strided_slice %208 {offsets = [0, 0], sizes = [2, 32], strides = [1, 1]} : vector<2x128xf32> to vector<2x32xf32>
    %211 = vector.extract_strided_slice %208 {offsets = [0, 32], sizes = [2, 32], strides = [1, 1]} : vector<2x128xf32> to vector<2x32xf32>
    %212 = vector.extract_strided_slice %209 {offsets = [0, 64], sizes = [2, 32], strides = [1, 1]} : vector<2x128xf32> to vector<2x32xf32>
    %213 = vector.extract_strided_slice %208 {offsets = [0, 96], sizes = [2, 32], strides = [1, 1]} : vector<2x128xf32> to vector<2x32xf32>
    %214 = arith.mulf %211, %179 : vector<2x32xf32>
    %215 = arith.mulf %210, %212 : vector<2x32xf32>
    %216 = arith.addf %214, %215 : vector<2x32xf32>
    %217 = math.tanh %216 : vector<2x32xf32>
    %218 = arith.mulf %213, %217 : vector<2x32xf32>
    %cst_33 = arith.constant dense<0.000000e+00> : vector<2x256xf32>
    %219 = tpu.matmul %218, %17, %cst_33 {dimension_numbers = #tpu.dot_dimension_numbers<[1], [0], [0], [1], [0, 0, 1, 1], [], []>} : vector<2x32xf32>, vector<32x256xf32>, vector<2x256xf32> -> vector<2x256xf32>
    %220 = vector.extract_strided_slice %219 {offsets = [0, 128], sizes = [2, 128], strides = [1, 1]} : vector<2x256xf32> to vector<2x128xf32>
    %221 = arith.addf %220, %16 : vector<2x128xf32>
    %cst_34 = arith.constant dense<0.000000e+00> : vector<2x128xf32>
    %222 = tpu.matmul %203, %18, %cst_34 {dimension_numbers = #tpu.dot_dimension_numbers<[1], [0], [0], [1], [0, 0, 1, 1], [], []>} : vector<2x32xf32>, vector<32x128xf32>, vector<2x128xf32> -> vector<2x128xf32>
    %223 = arith.addf %221, %222 : vector<2x128xf32>
    %224 = vector.extract_strided_slice %219 {offsets = [0, 0], sizes = [2, 128], strides = [1, 1]} : vector<2x256xf32> to vector<2x128xf32>
    %225 = arith.addf %224, %12 : vector<2x128xf32>
    %226 = arith.negf %223 : vector<2x128xf32>
    %227 = math.exp %226 : vector<2x128xf32>
    %cst_35 = arith.constant 1.000000e+00 : f32
    %228 = vector.broadcast %cst_35 : f32 to vector<2x128xf32>
    %229 = arith.addf %228, %227 : vector<2x128xf32>
    %230 = arith.divf %228, %229 : vector<2x128xf32>
    %231 = math.tanh %223 : vector<2x128xf32>
    %232 = vector.extract_strided_slice %230 {offsets = [0, 0], sizes = [2, 32], strides = [1, 1]} : vector<2x128xf32> to vector<2x32xf32>
    %233 = vector.extract_strided_slice %230 {offsets = [0, 32], sizes = [2, 32], strides = [1, 1]} : vector<2x128xf32> to vector<2x32xf32>
    %234 = vector.extract_strided_slice %231 {offsets = [0, 64], sizes = [2, 32], strides = [1, 1]} : vector<2x128xf32> to vector<2x32xf32>
    %235 = vector.extract_strided_slice %230 {offsets = [0, 96], sizes = [2, 32], strides = [1, 1]} : vector<2x128xf32> to vector<2x32xf32>
    %236 = arith.mulf %233, %201 : vector<2x32xf32>
    %237 = arith.mulf %232, %234 : vector<2x32xf32>
    %238 = arith.addf %236, %237 : vector<2x32xf32>
    %239 = math.tanh %238 : vector<2x32xf32>
    %240 = arith.mulf %235, %239 : vector<2x32xf32>
    %241 = arith.negf %225 : vector<2x128xf32>
    %242 = math.exp %241 : vector<2x128xf32>
    %cst_36 = arith.constant 1.000000e+00 : f32
    %243 = vector.broadcast %cst_36 : f32 to vector<2x128xf32>
    %244 = arith.addf %243, %242 : vector<2x128xf32>
    %245 = arith.divf %243, %244 : vector<2x128xf32>
    %246 = math.tanh %225 : vector<2x128xf32>
    %247 = vector.extract_strided_slice %245 {offsets = [0, 0], sizes = [2, 32], strides = [1, 1]} : vector<2x128xf32> to vector<2x32xf32>
    %248 = vector.extract_strided_slice %245 {offsets = [0, 32], sizes = [2, 32], strides = [1, 1]} : vector<2x128xf32> to vector<2x32xf32>
    %249 = vector.extract_strided_slice %246 {offsets = [0, 64], sizes = [2, 32], strides = [1, 1]} : vector<2x128xf32> to vector<2x32xf32>
    %250 = vector.extract_strided_slice %245 {offsets = [0, 96], sizes = [2, 32], strides = [1, 1]} : vector<2x128xf32> to vector<2x32xf32>
    %251 = arith.mulf %248, %216 : vector<2x32xf32>
    %252 = arith.mulf %247, %249 : vector<2x32xf32>
    %253 = arith.addf %251, %252 : vector<2x32xf32>
    %254 = math.tanh %253 : vector<2x32xf32>
    %255 = arith.mulf %250, %254 : vector<2x32xf32>
    %cst_37 = arith.constant dense<0.000000e+00> : vector<2x256xf32>
    %256 = tpu.matmul %255, %17, %cst_37 {dimension_numbers = #tpu.dot_dimension_numbers<[1], [0], [0], [1], [0, 0, 1, 1], [], []>} : vector<2x32xf32>, vector<32x256xf32>, vector<2x256xf32> -> vector<2x256xf32>
    %257 = vector.extract_strided_slice %256 {offsets = [0, 128], sizes = [2, 128], strides = [1, 1]} : vector<2x256xf32> to vector<2x128xf32>
    %258 = arith.addf %257, %16 : vector<2x128xf32>
    %cst_38 = arith.constant dense<0.000000e+00> : vector<2x128xf32>
    %259 = tpu.matmul %240, %18, %cst_38 {dimension_numbers = #tpu.dot_dimension_numbers<[1], [0], [0], [1], [0, 0, 1, 1], [], []>} : vector<2x32xf32>, vector<32x128xf32>, vector<2x128xf32> -> vector<2x128xf32>
    %260 = arith.addf %258, %259 : vector<2x128xf32>
    %261 = vector.extract_strided_slice %256 {offsets = [0, 0], sizes = [2, 128], strides = [1, 1]} : vector<2x256xf32> to vector<2x128xf32>
    %262 = arith.addf %261, %13 : vector<2x128xf32>
    %263 = arith.negf %260 : vector<2x128xf32>
    %264 = math.exp %263 : vector<2x128xf32>
    %cst_39 = arith.constant 1.000000e+00 : f32
    %265 = vector.broadcast %cst_39 : f32 to vector<2x128xf32>
    %266 = arith.addf %265, %264 : vector<2x128xf32>
    %267 = arith.divf %265, %266 : vector<2x128xf32>
    %268 = math.tanh %260 : vector<2x128xf32>
    %269 = vector.extract_strided_slice %267 {offsets = [0, 0], sizes = [2, 32], strides = [1, 1]} : vector<2x128xf32> to vector<2x32xf32>
    %270 = vector.extract_strided_slice %267 {offsets = [0, 32], sizes = [2, 32], strides = [1, 1]} : vector<2x128xf32> to vector<2x32xf32>
    %271 = vector.extract_strided_slice %268 {offsets = [0, 64], sizes = [2, 32], strides = [1, 1]} : vector<2x128xf32> to vector<2x32xf32>
    %272 = vector.extract_strided_slice %267 {offsets = [0, 96], sizes = [2, 32], strides = [1, 1]} : vector<2x128xf32> to vector<2x32xf32>
    %273 = arith.mulf %270, %238 : vector<2x32xf32>
    %274 = arith.mulf %269, %271 : vector<2x32xf32>
    %275 = arith.addf %273, %274 : vector<2x32xf32>
    %276 = math.tanh %275 : vector<2x32xf32>
    %277 = arith.mulf %272, %276 : vector<2x32xf32>
    %278 = arith.negf %262 : vector<2x128xf32>
    %279 = math.exp %278 : vector<2x128xf32>
    %cst_40 = arith.constant 1.000000e+00 : f32
    %280 = vector.broadcast %cst_40 : f32 to vector<2x128xf32>
    %281 = arith.addf %280, %279 : vector<2x128xf32>
    %282 = arith.divf %280, %281 : vector<2x128xf32>
    %283 = math.tanh %262 : vector<2x128xf32>
    %284 = vector.extract_strided_slice %282 {offsets = [0, 0], sizes = [2, 32], strides = [1, 1]} : vector<2x128xf32> to vector<2x32xf32>
    %285 = vector.extract_strided_slice %282 {offsets = [0, 32], sizes = [2, 32], strides = [1, 1]} : vector<2x128xf32> to vector<2x32xf32>
    %286 = vector.extract_strided_slice %283 {offsets = [0, 64], sizes = [2, 32], strides = [1, 1]} : vector<2x128xf32> to vector<2x32xf32>
    %287 = vector.extract_strided_slice %282 {offsets = [0, 96], sizes = [2, 32], strides = [1, 1]} : vector<2x128xf32> to vector<2x32xf32>
    %288 = arith.mulf %285, %253 : vector<2x32xf32>
    %289 = arith.mulf %284, %286 : vector<2x32xf32>
    %290 = arith.addf %288, %289 : vector<2x32xf32>
    %291 = math.tanh %290 : vector<2x32xf32>
    %292 = arith.mulf %287, %291 : vector<2x32xf32>
    %cst_41 = arith.constant dense<0.000000e+00> : vector<2x256xf32>
    %293 = tpu.matmul %292, %17, %cst_41 {dimension_numbers = #tpu.dot_dimension_numbers<[1], [0], [0], [1], [0, 0, 1, 1], [], []>} : vector<2x32xf32>, vector<32x256xf32>, vector<2x256xf32> -> vector<2x256xf32>
    %294 = vector.extract_strided_slice %293 {offsets = [0, 128], sizes = [2, 128], strides = [1, 1]} : vector<2x256xf32> to vector<2x128xf32>
    %295 = arith.addf %294, %16 : vector<2x128xf32>
    %cst_42 = arith.constant dense<0.000000e+00> : vector<2x128xf32>
    %296 = tpu.matmul %277, %18, %cst_42 {dimension_numbers = #tpu.dot_dimension_numbers<[1], [0], [0], [1], [0, 0, 1, 1], [], []>} : vector<2x32xf32>, vector<32x128xf32>, vector<2x128xf32> -> vector<2x128xf32>
    %297 = arith.addf %295, %296 : vector<2x128xf32>
    %298 = arith.negf %297 : vector<2x128xf32>
    %299 = math.exp %298 : vector<2x128xf32>
    %cst_43 = arith.constant 1.000000e+00 : f32
    %300 = vector.broadcast %cst_43 : f32 to vector<2x128xf32>
    %301 = arith.addf %300, %299 : vector<2x128xf32>
    %302 = arith.divf %300, %301 : vector<2x128xf32>
    %303 = math.tanh %297 : vector<2x128xf32>
    %304 = vector.extract_strided_slice %302 {offsets = [0, 0], sizes = [2, 32], strides = [1, 1]} : vector<2x128xf32> to vector<2x32xf32>
    %305 = vector.extract_strided_slice %302 {offsets = [0, 32], sizes = [2, 32], strides = [1, 1]} : vector<2x128xf32> to vector<2x32xf32>
    %306 = vector.extract_strided_slice %303 {offsets = [0, 64], sizes = [2, 32], strides = [1, 1]} : vector<2x128xf32> to vector<2x32xf32>
    %307 = vector.extract_strided_slice %302 {offsets = [0, 96], sizes = [2, 32], strides = [1, 1]} : vector<2x128xf32> to vector<2x32xf32>
    %308 = arith.mulf %305, %275 : vector<2x32xf32>
    %309 = arith.mulf %304, %306 : vector<2x32xf32>
    %310 = arith.addf %308, %309 : vector<2x32xf32>
    %311 = math.tanh %310 : vector<2x32xf32>
    %312 = arith.mulf %307, %311 : vector<2x32xf32>
    %313 = tpu.concatenate %55, %92, %129, %166, %203, %240, %277, %312 in 0 : vector<2x32xf32>, vector<2x32xf32>, vector<2x32xf32>, vector<2x32xf32>, vector<2x32xf32>, vector<2x32xf32>, vector<2x32xf32>, vector<2x32xf32> -> vector<16x32xf32>
    %c0_44 = arith.constant 0 : index
    %c0_45 = arith.constant 0 : index
    %314 = vector.load %arg6[%c0_44, %c0_45] : memref<32x1024xf32, #tpu.memory_space<vmem>>, vector<32x1024xf32>
    %cst_46 = arith.constant dense<0.000000e+00> : vector<16x1024xf32>
    %315 = tpu.matmul %313, %314, %cst_46 {dimension_numbers = #tpu.dot_dimension_numbers<[1], [0], [0], [1], [0, 0, 1, 1], [], []>} : vector<16x32xf32>, vector<32x1024xf32>, vector<16x1024xf32> -> vector<16x1024xf32>
    %c0_47 = arith.constant 0 : index
    %c0_48 = arith.constant 0 : index
    %316 = vector.load %arg7[%c0_47, %c0_48] : memref<1x1024xf32, #tpu.memory_space<vmem>>, vector<1x1024xf32>
    %317 = vector.broadcast %316 : vector<1x1024xf32> to vector<16x1024xf32>
    %318 = arith.addf %315, %317 : vector<16x1024xf32>
    %cst_49 = arith.constant 0.000000e+00 : f32
    %319 = vector.broadcast %cst_49 : f32 to vector<16x1024xf32>
    %320 = arith.maximumf %318, %319 : vector<16x1024xf32>
    %c0_50 = arith.constant 0 : index
    %c0_51 = arith.constant 0 : index
    %321 = vector.load %arg8[%c0_50, %c0_51] : memref<1024x128xf32, #tpu.memory_space<vmem>>, vector<1024x128xf32>
    %cst_52 = arith.constant dense<0.000000e+00> : vector<16x128xf32>
    %322 = tpu.matmul %320, %321, %cst_52 {dimension_numbers = #tpu.dot_dimension_numbers<[1], [0], [0], [1], [0, 0, 1, 1], [], []>} : vector<16x1024xf32>, vector<1024x128xf32>, vector<16x128xf32> -> vector<16x128xf32>
    %c0_53 = arith.constant 0 : index
    %c0_54 = arith.constant 0 : index
    %323 = vector.load %arg9[%c0_53, %c0_54] : memref<1x128xf32, #tpu.memory_space<vmem>>, vector<1x128xf32>
    %324 = vector.broadcast %323 : vector<1x128xf32> to vector<16x128xf32>
    %325 = arith.addf %322, %324 : vector<16x128xf32>
    %c0_55 = arith.constant 0 : index
    %c0_56 = arith.constant 0 : index
    %326 = vector.load %arg10[%c0_55, %c0_56] : memref<1x128xf32, #tpu.memory_space<vmem>>, vector<1x128xf32>
    %cst_57 = arith.constant 0.000000e+00 : f32
    %327 = vector.broadcast %cst_57 : f32 to vector<16x128xf32>
    %328 = arith.minimumf %325, %327 : vector<16x128xf32>
    %329 = vector.broadcast %326 : vector<1x128xf32> to vector<16x128xf32>
    %330 = arith.mulf %329, %328 : vector<16x128xf32>
    %331 = arith.subf %325, %330 : vector<16x128xf32>
    %c0_58 = arith.constant 0 : index
    %c0_59 = arith.constant 0 : index
    %332 = vector.load %arg11[%c0_58, %c0_59] : memref<128x128xf32, #tpu.memory_space<vmem>>, vector<128x128xf32>
    %cst_60 = arith.constant dense<0.000000e+00> : vector<16x128xf32>
    %333 = tpu.matmul %331, %332, %cst_60 {dimension_numbers = #tpu.dot_dimension_numbers<[1], [0], [0], [1], [0, 0, 1, 1], [], []>} : vector<16x128xf32>, vector<128x128xf32>, vector<16x128xf32> -> vector<16x128xf32>
    %c0_61 = arith.constant 0 : index
    %c0_62 = arith.constant 0 : index
    %334 = vector.load %arg12[%c0_61, %c0_62] : memref<1x128xf32, #tpu.memory_space<vmem>>, vector<1x128xf32>
    %335 = vector.broadcast %334 : vector<1x128xf32> to vector<16x128xf32>
    %336 = arith.addf %333, %335 : vector<16x128xf32>
    %c0_63 = arith.constant 0 : index
    %c0_64 = arith.constant 0 : index
    %337 = vector.load %arg13[%c0_63, %c0_64] : memref<16x128xf32, #tpu.memory_space<vmem>>, vector<16x128xf32>
    tpu.vector_store %arg13[%c0_63, %c0_64], %336 {strides = array<i32>} : memref<16x128xf32, #tpu.memory_space<vmem>>, vector<16x128xf32>,
    return
  }
}

</mosaic_0001>

<bundles_post_ra>
// kernel: lstm_module_forward.1
= control target key start
LH: loop header
LB: loop body
LE: loop exit
PB: predicated region body
PF: predicated region fallthrough
CT: control target
= control target key end

     0   :  { %18 = vsyncpa [#allocation3], 0  ;;  %s3965_s0 = inlined_call_operand.vmem [shape: f32[16,23], index: 0, kind: input, shape index: {}]   ;;  %s3966_s1 = inlined_call_operand.hbm [shape: f32[23,128], index: 1, kind: input, shape index: {}]   ;;  %s3967_s2 = inlined_call_operand.vmem [shape: f32[1,128], index: 2, kind: input, shape index: {}]   ;;  %s3968_s3 = inlined_call_operand.hbm [shape: f32[32,256], index: 3, kind: input, shape index: {}]   ;;  %s3969_s4 = inlined_call_operand.vmem [shape: f32[32,128], index: 4, kind: input, shape index: {}]   ;;  %s3970_s5 = inlined_call_operand.vmem [shape: f32[1,128], index: 5, kind: input, shape index: {}]   ;;  %s3971_s6 = inlined_call_operand.hbm [shape: f32[32,1024], index: 6, kind: input, shape index: {}]   ;;  %s3972_s7 = inlined_call_operand.vmem [shape: f32[1,1024], index: 7, kind: input, shape index: {}]   ;;  %s3973_s8 = inlined_call_operand.hbm [shape: f32[1024,128], index: 8, kind: input, shape index: {}]   ;;  %s3974_s9 = inlined_call_operand.vmem [shape: f32[1,128], index: 9, kind: input, shape index: {}]   ;;  %s3975_s10 = inlined_call_operand.vmem [shape: f32[1,128], index: 10, kind: input, shape index: {}]   ;;  %s3976_s11 = inlined_call_operand.vmem [shape: f32[128,128], index: 11, kind: input, shape index: {}]   ;;  %s3977_s12 = inlined_call_operand.vmem [shape: f32[1,128], index: 12, kind: input, shape index: {}]   ;;  %s3978_s13 = inlined_call_operand.vmem [shape: f32[16,128], index: 13, kind: output, shape index: {}]  }
   0x1   :  { %19 = vsyncpa [#allocation5], 0 }
   0x2   :  { %20 = vsyncpa [#allocation8], 0  ;;  %s3359_s25 = smov [#allocation4]  }
   0x3   :  { %s42_s26 = sshll.u32 %s3359_s25, 4  ;;  %s43_s26 = int_to_ptr.vmem [resolvable:$true] %s42_s26 }
   0x4   :  { %s3281_s27 = scalar_lea.vmem %s43_s26, 1024  ;;  %p3286_p1 = scmp.lt.s32.totalorder %s43_s26, %s43_s26 }
   0x5   :  { %p3282_p0 = scmp.ne.s32.totalorder %s43_s26, %s3281_s27  ;;  %p3287_p2 = scmp.lt.s32.totalorder %s3281_s27, %s3281_s27 }
   0x7   :  { %p3288_p3 = por %p3287_p2, %p3286_p1 }
   0x9   :  { %p3289_p4 = pnand %p3288_p3, %p3282_p0 }
   0xb   :  { %3292 = shalt.err (!%p3289_p4)
}
   0xc   :  { %s3360_s28 = smov 256   ;;  %s3361_s29 = smov 16  }
   0xd   :  { %48 = dma.hbm_to_vmem [thread:$0]  %s3968_s3, 1024, %s43_s26, [#allocation5], %s3360_s28, %s3360_s28, %s3361_s29  }
   0xe   :  { %s3362_s15 = smov [#allocation2]  }
   0xf   :  { %s28_s16 = sshll.u32 %s3362_s15, 4  ;;  %s29_s16 = int_to_ptr.vmem [resolvable:$true] %s28_s16 }
  0x10   :  { %s3301_s17 = scalar_lea.vmem %s29_s16, 384  ;;  %p3306_p6 = scmp.lt.s32.totalorder %s29_s16, %s29_s16 }
  0x11   :  { %p3302_p5 = scmp.ne.s32.totalorder %s29_s16, %s3301_s17  ;;  %p3307_p7 = scmp.lt.s32.totalorder %s3301_s17, %s3301_s17 }
  0x13   :  { %p3308_p8 = por %p3307_p7, %p3306_p6 }
  0x15   :  { %p3309_p9 = pnand %p3308_p8, %p3302_p5 }
  0x17   :  { %3312 = shalt.err (!%p3309_p9)
}
  0x18   :  { %s3363_s18 = smov 128   ;;  %s3364_s19 = smov 8  }
  0x19   :  { %34 = dma.hbm_to_vmem [thread:$0]  %s3966_s1, 384, %s29_s16, [#allocation3], %s3363_s18, %s3363_s18, %s3364_s19  }
  0x1a   :  { %s3365_s22 = smov [#allocation6]  }
  0x1b   :  { %s58_s23 = sshll.u32 %s3365_s22, 4  ;;  %s59_s23 = int_to_ptr.vmem [resolvable:$true] %s58_s23 }
  0x1c   :  { %s3321_s3 = scalar_lea.vmem %s59_s23, 4096  ;;  %p3326_p11 = scmp.lt.s32.totalorder %s59_s23, %s59_s23 }
  0x1d   :  { %p3322_p10 = scmp.ne.s32.totalorder %s59_s23, %s3321_s3  ;;  %p3327_p12 = scmp.lt.s32.totalorder %s3321_s3, %s3321_s3 }
  0x1f   :  { %p3328_p13 = por %p3327_p12, %p3326_p11 }
  0x21   :  { %p3329_p0 = pnand %p3328_p13, %p3322_p10 }
  0x23   :  { %3332 = shalt.err (!%p3329_p0)
}
  0x24   :  { %s3366_s24 = smov 1024   ;;  %s3367_s25 = smov 64  }
  0x25   :  { %64 = dma.hbm_to_vmem [thread:$0]  %s3971_s6, 4096, %s59_s23, [#allocation5], %s3366_s24, %s3366_s24, %s3367_s25  }
  0x26   :  { %s3368_s28 = smov [#allocation7]  }
  0x27   :  { %s72_s29 = sshll.u32 %s3368_s28, 4  ;;  %s73_s29 = int_to_ptr.vmem [resolvable:$true] %s72_s29 }
  0x28   :  { %s3341_s1 = scalar_lea.vmem %s73_s29, 16384  ;;  %p3346_p2 = scmp.lt.s32.totalorder %s73_s29, %s73_s29 }
  0x29   :  { %p3342_p1 = scmp.ne.s32.totalorder %s73_s29, %s3341_s1  ;;  %p3347_p3 = scmp.lt.s32.totalorder %s3341_s1, %s3341_s1 }
  0x2b   :  { %p3348_p4 = por %p3347_p3, %p3346_p2 }
  0x2d   :  { %p3349_p5 = pnand %p3348_p4, %p3342_p1 }
  0x2f   :  { %3352 = shalt.err (!%p3349_p5)
}
  0x30   :  { %78 = dma.hbm_to_vmem [thread:$0]  %s3973_s8, 16384, %s73_s29, [#allocation8], %s3363_s18, %s3363_s18, %s3364_s19  }
  0x31   :  { %3353 = dma.done.wait [#allocation3], 384  }
  0x32   :  { %3354 = vsyncadd [#allocation3], 4294966912 }
  0x33   :  { %3355 = dma.done.wait [#allocation5], 5120  }
  0x34   :  { %3356 = vsyncadd [#allocation5], 4294962176 }
  0x35   :  { %3357 = dma.done.wait [#allocation8], 16384  }
  0x36   :  { %3358 = vsyncadd [#allocation8], 4294950912  ;;  %vm118_vm0 = vcmask 1046528   ;;  %vm111_vm1 = vcmask 187392   ;;  %v103_v0 = vld [vmem:[#allocation2 + $0x10] sm:$0x7f] }
  0x37   :  { %v102_v1 = vld [vmem:[#allocation2 + $0x8] sm:$0xff]  ;;  %3011 = vmatprep.subr.msk.mxu1 %vm118_vm0, %v103_v0  ;;  %v99_v2 = vld [vmem:[%s3965_s0] sm:$0xff]  ;;  %v3475_v20 = vld [vmem:[#allocation4 + $0x38] sm:$0xff]  ;;  %v3370_v24 = vmov 0.0   ;;  %vm243_vm2 = vcmask 261120   ;;  %vm3371_vm3 = vmmov 0  }
  0x38   :  { %3012 = vmatpush3.msk.msra.mxu1 %vm118_vm0, %v103_v0  ;;  %v101_v3 = vld [vmem:[#allocation2] sm:$0xff]  ;;  %3017 = vmatprep.mubr.msk.f32.mxu1 %vm111_vm1, %v99_v2  ;;  %v100_v4 = vld [vmem:[%s3965_s0 + $0x8] sm:$0xff]  ;;  %s3369_s0 = smov 32   ;;  %v3482_v23 = vld [vmem:[#allocation4 + $0x20] sm:$0xff]  ;;  %vm1782_vm4 = vcmask 1041408   ;;  %vm1784_vm5 = vcmask 1043456  }
  0x39   :  { %3013 = vmatprep.subr.mxu1 %v102_v1  ;;  %v2754_v5 = vld [vmem:[%s3967_s2] ss:$0 sm:$0xff]  ;;  %v3477_v21 = vld [vmem:[#allocation4 + $0x30] sm:$0xff]  ;;  %v3486_v25 = vld [vmem:[#allocation4 + $0x18] sm:$0xff]  ;;  %603 = vmatprep.subr.mxu0 %v3475_v20  ;;  %vm1786_vm6 = vcmask 1045504  }
  0x3a   :  { %3014 = vmatpush3.msra.mxu1 %v102_v1  ;;  %v3479_v22 = vld [vmem:[#allocation4 + $0x28] sm:$0xff]  ;;  %v3490_v26 = vld [vmem:[#allocation4 + $0x10] sm:$0xff]  ;;  %604 = vmatpush1.msra.mxu0 %v3477_v21  ;;  %v3498_v28 = vld [vmem:[#allocation4] sm:$0xff] }
  0x3b   :  { %3015 = vmatprep.subr.mxu1 %v101_v3  ;;  %v3494_v27 = vld [vmem:[#allocation4 + $0x8] sm:$0xff]  ;;  %605 = vmatprep.subr.mxu0 %v3479_v22  ;;  %v3551_v1 = vld [vmem:[%s3969_s4 + $0x18] sm:$0xff] }
  0x3c   :  { %3016 = vmatpush3.msra.mxu1 %v101_v3  ;;  %606 = vmatpush1.msra.mxu0 %v3482_v23  ;;  %v3527_v35 = vld [vmem:[%s3970_s5] ss:$0 sm:$0xff]  ;;  %v3557_v3 = vld [vmem:[%s3969_s4 + $0x10] sm:$0xff] }
  0x3d   :  { %3018 = vmatmul.mubr.msk.f32.vlgmr.msra.gmra.mxu1 %vm111_vm1, %v100_v4  ;;  %270 = vmatprep.subr.mxu1 %v3475_v20  ;;  %v3566_v4 = vld [vmem:[%s3969_s4 + $0x8] sm:$0xff] }
  0x3e   :  { %310 = vmatprep.mubr.f32.mxu1 %v3370_v24  ;;  %271 = vmatpush1.msra.mxu1 %v3477_v21 }
  0x3f   :  { %272 = vmatprep.subr.mxu1 %v3479_v22  ;;  %607 = vmatprep.subr.mxu0 %v3486_v25 }
  0x40   :  { %273 = vmatpush1.msra.mxu1 %v3482_v23  ;;  %608 = vmatpush1.msra.mxu0 %v3490_v26 }
  0x41   :  { %274 = vmatprep.subr.mxu1 %v3486_v25  ;;  %609 = vmatprep.subr.mxu0 %v3494_v27 }
  0x42   :  { %275 = vmatpush1.msra.mxu1 %v3490_v26  ;;  %610 = vmatpush1.msra.mxu0 %v3498_v28 }
  0x43   :  { %276 = vmatprep.subr.mxu1 %v3494_v27  ;;  %643 = vmatprep.mubr.f32.mxu0 %v3370_v24 }
  0x44   :  { %277 = vmatpush1.msra.mxu1 %v3498_v28  ;;  %807 = vmatprep.subr.mxu0 %v3475_v20 }
  0x45   :  { %399 = vmatprep.subr.mxu1 %v3475_v20 }
  0xfd   :  { %v3019_v6 = vpop.f32.mrf.mxu1 }
  0xfe   :  { %v3464_v7 = vadd.f32 %v3019_v6, %v2754_v5 }
  0xff   :  { %v188_v8 = vpop.f32.mrf.mxu1 }
 0x100   :  { %v3466_v9 = vadd.f32 %v2754_v5, %v188_v8  ;;  %v3573_v5 = vld [vmem:[%s3969_s4] sm:$0xff] }
 0x102   :  { %3145 = vtanh.f32 %v3466_v9  ;;  %v2759_v11 = vmul.f32 -1.442695, %v3466_v9  ;;  %v319_v33 = vrot.slane %v3466_v9, 2  ;;  %v523_v8 = vrot.slane %v3466_v9, 4 }
 0x104   :  { %3147 = vpow2.f32 %v2759_v11 }
 0x10f   :  { %v3146_v10 = vpop.eup %3145 }
 0x110   :  { %225 = vrot.lane.b32.xlu0 %v3146_v10, %s3367_s25 }
 0x111   :  { %v3148_v12 = vpop.eup %3147 }
 0x112   :  { %v219_v13 = vadd.f32 1.0, %v3148_v12 }
 0x114   :  { %3149 = vrcp.f32 %v219_v13 }
 0x121   :  { %v3150_v14 = vpop.eup %3149 }
 0x122   :  { %v223_v17 = vmul.f32 0.0, %v3150_v14 }
 0x182   :  { %v226_v15 = vpop.permute.xlu0 %225 }
 0x183   :  { %v228_v16 = vmul.f32 %v3150_v14, %v226_v15 }
 0x185   :  { %230 = vrot.lane.b32.xlu0 %v228_v16, %s3369_s0 }
 0x1f7   :  { %v231_v18 = vpop.permute.xlu0 %230 }
 0x1f8   :  { %v3472_v19 = vadd.f32 %v231_v18, %v223_v17 }
 0x1fa   :  { %3151 = vtanh.f32 %v3472_v19 }
 0x207   :  { %v3152_v29 = vpop.eup %3151 }
 0x208   :  { %236 = vrot.lane.b32.xlu1 %v3152_v29, %s3367_s25 }
 0x27a   :  { %v237_v30 = vpop.permute.xlu1 %236 }
 0x27b   :  { %v239_v31 = vmul.f32 %v3150_v14, %v237_v30 }
 0x27d   :  { %241 = vrot.lane.b32.xlu1 %v239_v31, %s3369_s0 }
 0x2ef   :  { %v242_v32 = vpop.permute.xlu1 %241 }
 0x2f0   :  { %2760 = vmatmul.mubr.msk.f32.vlgmr.msra.gmra.mxu1 %vm243_vm2, %v242_v32 }
 0x2f1   :  { %400 = vmatpush1.msra.mxu1 %v3477_v21  ;;  %439 = vmatprep.mubr.f32.mxu1 %v3370_v24 }
 0x2f2   :  { %401 = vmatprep.subr.mxu1 %v3479_v22 }
 0x2f3   :  { %402 = vmatpush1.msra.mxu1 %v3482_v23 }
 0x2f4   :  { %403 = vmatprep.subr.mxu1 %v3486_v25 }
 0x2f5   :  { %404 = vmatpush1.msra.mxu1 %v3490_v26 }
 0x2f6   :  { %405 = vmatprep.subr.mxu1 %v3494_v27 }
 0x2f7   :  { %406 = vmatpush1.msra.mxu1 %v3498_v28 }
 0x2f8   :  { %3020 = vmatprep.subr.mxu1 %v3370_v24 }
 0x3b0   :  { %v312_v34 = vpop.f32.mrf.mxu1 }
 0x3b1   :  { %v321_v36 = vadd.f32 %v319_v33, %v312_v34 }
 0x3b2   :  { %v314_v37 = vpop.f32.mrf.mxu1 }
 0x3b3   :  { %3153 = vtanh.f32 %v321_v36  ;;  %v317_v38 = vadd.f32 %v3527_v35, %v314_v37  ;;  %v2762_v41 = vmul.f32 -1.442695, %v321_v36 }
 0x3b5   :  { %3155 = vtanh.f32 %v317_v38  ;;  %v2761_v42 = vmul.f32 -1.442695, %v317_v38 }
 0x3b6   :  { %3157 = vpow2.f32 %v2762_v41 }
 0x3b7   :  { %3159 = vpow2.f32 %v2761_v42 }
 0x3c0   :  { %v3154_v39 = vpop.eup %3153 }
 0x3c1   :  { %355 = vrot.lane.b32.xlu0 %v3154_v39, %s3367_s25 }
 0x3c2   :  { %v3156_v40 = vpop.eup %3155 }
 0x3c3   :  { %331 = vrot.lane.b32.xlu1 %v3156_v40, %s3367_s25  ;;  %v3158_v43 = vpop.eup %3157 }
 0x3c4   :  { %v3160_v44 = vpop.eup %3159  ;;  %v349_v45 = vadd.f32 1.0, %v3158_v43 }
 0x3c5   :  { %v325_v46 = vadd.f32 1.0, %v3160_v44 }
 0x3c6   :  { %3161 = vrcp.f32 %v349_v45 }
 0x3c7   :  { %3163 = vrcp.f32 %v325_v46 }
 0x3d3   :  { %v3162_v47 = vpop.eup %3161 }
 0x3d4   :  { %v3164_v50 = vpop.eup %3163  ;;  %v353_v53 = vmul.f32 %v3162_v47, %v3472_v19 }
 0x3d5   :  { %v329_v56 = vmul.f32 0.0, %v3164_v50 }
 0x433   :  { %v356_v48 = vpop.permute.xlu0 %355 }
 0x434   :  { %v358_v49 = vmul.f32 %v3162_v47, %v356_v48 }
 0x435   :  { %v332_v51 = vpop.permute.xlu1 %331 }
 0x436   :  { %360 = vrot.lane.b32.xlu0 %v358_v49, %s3369_s0  ;;  %v334_v52 = vmul.f32 %v3164_v50, %v332_v51 }
 0x438   :  { %336 = vrot.lane.b32.xlu1 %v334_v52, %s3369_s0 }
 0x4a8   :  { %v361_v54 = vpop.permute.xlu0 %360 }
 0x4a9   :  { %v3535_v55 = vadd.f32 %v361_v54, %v353_v53 }
 0x4aa   :  { %v337_v57 = vpop.permute.xlu1 %336 }
 0x4ab   :  { %3165 = vtanh.f32 %v3535_v55  ;;  %v3538_v58 = vadd.f32 %v337_v57, %v329_v56 }
 0x4ad   :  { %3167 = vtanh.f32 %v3538_v58 }
 0x4b8   :  { %v3166_v59 = vpop.eup %3165 }
 0x4b9   :  { %366 = vrot.lane.b32.xlu0 %v3166_v59, %s3367_s25 }
 0x4ba   :  { %v3168_v60 = vpop.eup %3167 }
 0x4bb   :  { %342 = vrot.lane.b32.xlu1 %v3168_v60, %s3367_s25 }
 0x52b   :  { %v367_v61 = vpop.permute.xlu0 %366 }
 0x52c   :  { %v369_v62 = vmul.f32 %v3162_v47, %v367_v61 }
 0x52d   :  { %v343_v63 = vpop.permute.xlu1 %342 }
 0x52e   :  { %371 = vrot.lane.b32.xlu0 %v369_v62, %s3369_s0  ;;  %v3544_v0 = vmul.f32 %v3164_v50, %v343_v63 }
 0x530   :  { %448 = vrot.lane.b32.xlu1 %v3544_v0, %s3369_s0 }
 0x5a0   :  { %v372_v2 = vpop.permute.xlu0 %371 }
 0x5a1   :  { %2763 = vmatmul.mubr.msk.f32.vlgmr.msra.gmra.mxu1 %vm243_vm2, %v372_v2 }
 0x5a2   :  { %3021 = vmatpush3.msra.mxu1 %v3551_v1  ;;  %3028 = vmatprep.mubr.msk.f32.mxu1 %vm3371_vm3, %v3370_v24  ;;  %v449_v6 = vpop.permute.xlu1 %448 }
 0x5a3   :  { %3022 = vmatprep.subr.mxu1 %v3370_v24 }
 0x5a4   :  { %3023 = vmatpush3.msra.mxu1 %v3557_v3 }
 0x5a5   :  { %3024 = vmatprep.subr.mxu1 %v3370_v24 }
 0x5a6   :  { %3025 = vmatpush3.msra.mxu1 %v3566_v4 }
 0x5a7   :  { %3026 = vmatprep.subr.mxu1 %v3370_v24 }
 0x5a8   :  { %3027 = vmatpush3.msra.mxu1 %v3573_v5 }
 0x5a9   :  { %3029 = vmatmul.mubr.msk.f32.vlgmr.msra.gmra.mxu1 %vm243_vm2, %v449_v6  ;;  %3031 = vmatprep.subr.mxu1 %v3370_v24 }
 0x5aa   :  { %3032 = vmatpush3.msra.mxu1 %v3551_v1  ;;  %3039 = vmatprep.mubr.msk.f32.mxu1 %vm3371_vm3, %v3370_v24 }
 0x5ab   :  { %3033 = vmatprep.subr.mxu1 %v3370_v24 }
 0x5ac   :  { %3034 = vmatpush3.msra.mxu1 %v3557_v3 }
 0x5ad   :  { %3035 = vmatprep.subr.mxu1 %v3370_v24 }
 0x5ae   :  { %3036 = vmatpush3.msra.mxu1 %v3566_v4 }
 0x5af   :  { %3037 = vmatprep.subr.mxu1 %v3370_v24 }
 0x5b0   :  { %3038 = vmatpush3.msra.mxu1 %v3573_v5 }
 0x5b1   :  { %3042 = vmatprep.subr.mxu1 %v3370_v24 }
 0x661   :  { %v441_v10 = vpop.f32.mrf.mxu1 }
 0x662   :  { %v525_v11 = vadd.f32 %v523_v8, %v441_v10 }
 0x663   :  { %v443_v12 = vpop.f32.mrf.mxu1 }
 0x664   :  { %3169 = vtanh.f32 %v525_v11  ;;  %v446_v13 = vadd.f32 %v3527_v35, %v443_v12  ;;  %v2766_v19 = vmul.f32 -1.442695, %v525_v11 }
 0x669   :  { %v518_v14 = vpop.f32.mrf.mxu1 }
 0x66a   :  { %v522_v15 = vadd.f32 %v518_v14, %v446_v13 }
 0x66b   :  { %v3030_v16 = vpop.f32.mrf.mxu1 }
 0x66c   :  { %3171 = vtanh.f32 %v522_v15  ;;  %v2765_v29 = vmul.f32 -1.442695, %v522_v15 }
 0x66d   :  { %3173 = vpow2.f32 %v2766_v19 }
 0x66e   :  { %3175 = vpow2.f32 %v2765_v29 }
 0x671   :  { %v3170_v17 = vpop.eup %3169 }
 0x672   :  { %559 = vrot.lane.b32.xlu0 %v3170_v17, %s3367_s25 }
 0x679   :  { %v3172_v18 = vpop.eup %3171 }
 0x67a   :  { %535 = vrot.lane.b32.xlu1 %v3172_v18, %s3367_s25  ;;  %v3174_v30 = vpop.eup %3173 }
 0x67b   :  { %v553_v31 = vadd.f32 1.0, %v3174_v30  ;;  %v3176_v32 = vpop.eup %3175 }
 0x67c   :  { %v529_v33 = vadd.f32 1.0, %v3176_v32 }
 0x67d   :  { %3177 = vrcp.f32 %v553_v31 }
 0x67e   :  { %3179 = vrcp.f32 %v529_v33 }
 0x68a   :  { %v3178_v34 = vpop.eup %3177 }
 0x68b   :  { %v3180_v38 = vpop.eup %3179  ;;  %v557_v41 = vmul.f32 %v3178_v34, %v3535_v55  ;;  %v727_v55 = vrot.slane %v3466_v9, 6 }
 0x68c   :  { %v533_v44 = vmul.f32 %v3180_v38, %v3538_v58 }
 0x6e4   :  { %v560_v36 = vpop.permute.xlu0 %559 }
 0x6e5   :  { %v562_v37 = vmul.f32 %v3178_v34, %v560_v36 }
 0x6e7   :  { %564 = vrot.lane.b32.xlu0 %v562_v37, %s3369_s0 }
 0x6ec   :  { %v536_v39 = vpop.permute.xlu1 %535 }
 0x6ed   :  { %v538_v40 = vmul.f32 %v3180_v38, %v536_v39 }
 0x6ef   :  { %540 = vrot.lane.b32.xlu1 %v538_v40, %s3369_s0 }
 0x759   :  { %v565_v42 = vpop.permute.xlu0 %564 }
 0x75a   :  { %v3597_v43 = vadd.f32 %v565_v42, %v557_v41 }
 0x75c   :  { %3181 = vtanh.f32 %v3597_v43 }
 0x761   :  { %v541_v45 = vpop.permute.xlu1 %540 }
 0x762   :  { %v3601_v46 = vadd.f32 %v541_v45, %v533_v44 }
 0x764   :  { %3183 = vtanh.f32 %v3601_v46 }
 0x769   :  { %v3182_v47 = vpop.eup %3181 }
 0x76a   :  { %570 = vrot.lane.b32.xlu0 %v3182_v47, %s3367_s25 }
 0x771   :  { %v3184_v48 = vpop.eup %3183 }
 0x772   :  { %546 = vrot.lane.b32.xlu1 %v3184_v48, %s3367_s25 }
 0x7dc   :  { %v571_v49 = vpop.permute.xlu0 %570 }
 0x7dd   :  { %v573_v50 = vmul.f32 %v3178_v34, %v571_v49 }
 0x7df   :  { %575 = vrot.lane.b32.xlu0 %v573_v50, %s3369_s0 }
 0x7e4   :  { %v547_v51 = vpop.permute.xlu1 %546 }
 0x7e5   :  { %v3607_v52 = vmul.f32 %v3180_v38, %v547_v51 }
 0x7e7   :  { %652 = vrot.lane.b32.xlu1 %v3607_v52, %s3369_s0  ;;  %v1769_v39 = vrot.slane %v3607_v52, 6 }
 0x851   :  { %v576_v53 = vpop.permute.xlu0 %575 }
 0x852   :  { %2767 = vmatmul.mubr.msk.f32.vlgmr.msra.gmra.mxu0 %vm243_vm2, %v576_v53 }
 0x853   :  { %808 = vmatpush1.msra.mxu0 %v3477_v21  ;;  %847 = vmatprep.mubr.f32.mxu0 %v3370_v24 }
 0x854   :  { %809 = vmatprep.subr.mxu0 %v3479_v22 }
 0x855   :  { %810 = vmatpush1.msra.mxu0 %v3482_v23 }
 0x856   :  { %811 = vmatprep.subr.mxu0 %v3486_v25 }
 0x857   :  { %812 = vmatpush1.msra.mxu0 %v3490_v26 }
 0x858   :  { %813 = vmatprep.subr.mxu0 %v3494_v27 }
 0x859   :  { %v653_v54 = vpop.permute.xlu1 %652  ;;  %814 = vmatpush1.msra.mxu0 %v3498_v28 }
 0x85a   :  { %3040 = vmatmul.mubr.msk.f32.vlgmr.msra.gmra.mxu1 %vm243_vm2, %v653_v54  ;;  %1009 = vmatprep.subr.mxu0 %v3475_v20 }
 0x85b   :  { %3043 = vmatpush3.msra.mxu1 %v3551_v1  ;;  %3050 = vmatprep.mubr.msk.f32.mxu1 %vm3371_vm3, %v3370_v24 }
 0x85c   :  { %3044 = vmatprep.subr.mxu1 %v3370_v24 }
 0x85d   :  { %3045 = vmatpush3.msra.mxu1 %v3557_v3 }
 0x85e   :  { %3046 = vmatprep.subr.mxu1 %v3370_v24 }
 0x85f   :  { %3047 = vmatpush3.msra.mxu1 %v3566_v4 }
 0x860   :  { %3048 = vmatprep.subr.mxu1 %v3370_v24 }
 0x861   :  { %3049 = vmatpush3.msra.mxu1 %v3573_v5 }
 0x862   :  { %3053 = vmatprep.subr.mxu1 %v3370_v24 }
 0x912   :  { %v645_v56 = vpop.f32.mrf.mxu0 }
 0x913   :  { %v729_v57 = vadd.f32 %v727_v55, %v645_v56 }
 0x914   :  { %v647_v58 = vpop.f32.mrf.mxu0 }
 0x915   :  { %3185 = vtanh.f32 %v729_v57  ;;  %v650_v59 = vadd.f32 %v3527_v35, %v647_v58  ;;  %v2770_v6 = vmul.f32 -1.442695, %v729_v57 }
 0x91a   :  { %v722_v60 = vpop.f32.mrf.mxu1 }
 0x91b   :  { %v726_v61 = vadd.f32 %v722_v60, %v650_v59 }
 0x91c   :  { %v3041_v62 = vpop.f32.mrf.mxu1 }
 0x91d   :  { %3187 = vtanh.f32 %v726_v61  ;;  %v2769_v8 = vmul.f32 -1.442695, %v726_v61 }
 0x91e   :  { %3189 = vpow2.f32 %v2770_v6 }
 0x91f   :  { %3191 = vpow2.f32 %v2769_v8 }
 0x922   :  { %v3186_v63 = vpop.eup %3185 }
 0x923   :  { %763 = vrot.lane.b32.xlu0 %v3186_v63, %s3367_s25 }
 0x92a   :  { %v3188_v2 = vpop.eup %3187 }
 0x92b   :  { %739 = vrot.lane.b32.xlu1 %v3188_v2, %s3367_s25  ;;  %v3190_v9 = vpop.eup %3189 }
 0x92c   :  { %v757_v10 = vadd.f32 1.0, %v3190_v9  ;;  %v3192_v11 = vpop.eup %3191 }
 0x92d   :  { %v733_v12 = vadd.f32 1.0, %v3192_v11 }
 0x92e   :  { %3193 = vrcp.f32 %v757_v10 }
 0x92f   :  { %3195 = vrcp.f32 %v733_v12 }
 0x93b   :  { %v3194_v13 = vpop.eup %3193 }
 0x93c   :  { %v3196_v16 = vpop.eup %3195  ;;  %v761_v19 = vmul.f32 %v3194_v13, %v3597_v43  ;;  %v1783_v43 = vsel %vm1782_vm4, %v3544_v0, %v1769_v39 }
 0x93d   :  { %v737_v31 = vmul.f32 %v3196_v16, %v3601_v46 }
 0x995   :  { %v764_v14 = vpop.permute.xlu0 %763 }
 0x996   :  { %v766_v15 = vmul.f32 %v3194_v13, %v764_v14 }
 0x998   :  { %768 = vrot.lane.b32.xlu0 %v766_v15, %s3369_s0 }
 0x99d   :  { %v740_v17 = vpop.permute.xlu1 %739 }
 0x99e   :  { %v742_v18 = vmul.f32 %v3196_v16, %v740_v17 }
 0x9a0   :  { %744 = vrot.lane.b32.xlu1 %v742_v18, %s3369_s0 }
 0xa0a   :  { %v769_v29 = vpop.permute.xlu0 %768 }
 0xa0b   :  { %v3639_v30 = vadd.f32 %v769_v29, %v761_v19 }
 0xa0d   :  { %3197 = vtanh.f32 %v3639_v30 }
 0xa12   :  { %v745_v32 = vpop.permute.xlu1 %744 }
 0xa13   :  { %v3643_v33 = vadd.f32 %v745_v32, %v737_v31 }
 0xa15   :  { %3199 = vtanh.f32 %v3643_v33 }
 0xa1a   :  { %v3198_v34 = vpop.eup %3197 }
 0xa1b   :  { %774 = vrot.lane.b32.xlu0 %v3198_v34, %s3367_s25  ;;  %v1134_v34 = vrot.slane %v3464_v7, 2 }
 0xa22   :  { %v3200_v36 = vpop.eup %3199 }
 0xa23   :  { %750 = vrot.lane.b32.xlu1 %v3200_v36, %s3367_s25 }
 0xa8d   :  { %v775_v37 = vpop.permute.xlu0 %774 }
 0xa8e   :  { %v777_v38 = vmul.f32 %v3194_v13, %v775_v37 }
 0xa90   :  { %779 = vrot.lane.b32.xlu0 %v777_v38, %s3369_s0 }
 0xa95   :  { %v751_v40 = vpop.permute.xlu1 %750 }
 0xa96   :  { %v753_v41 = vmul.f32 %v3196_v16, %v751_v40 }
 0xa98   :  { %v1771_v42 = vrot.slane %v753_v41, 4  ;;  %856 = vrot.lane.b32.xlu1 %v753_v41, %s3369_s0 }
 0xa9a   :  { %v3654_v44 = vsel %vm1784_vm5, %v1783_v43, %v1771_v42 }
 0xb02   :  { %v780_v45 = vpop.permute.xlu0 %779 }
 0xb03   :  { %2771 = vmatmul.mubr.msk.f32.vlgmr.msra.gmra.mxu0 %vm243_vm2, %v780_v45 }
 0xb04   :  { %1010 = vmatpush1.msra.mxu0 %v3477_v21  ;;  %1049 = vmatprep.mubr.f32.mxu0 %v3370_v24 }
 0xb05   :  { %1011 = vmatprep.subr.mxu0 %v3479_v22 }
 0xb06   :  { %1012 = vmatpush1.msra.mxu0 %v3482_v23 }
 0xb07   :  { %1013 = vmatprep.subr.mxu0 %v3486_v25 }
 0xb08   :  { %1014 = vmatpush1.msra.mxu0 %v3490_v26 }
 0xb09   :  { %1015 = vmatprep.subr.mxu0 %v3494_v27 }
 0xb0a   :  { %v857_v0 = vpop.permute.xlu1 %856  ;;  %1016 = vmatpush1.msra.mxu0 %v3498_v28 }
 0xb0b   :  { %3051 = vmatmul.mubr.msk.f32.vlgmr.msra.gmra.mxu1 %vm243_vm2, %v857_v0  ;;  %1214 = vmatprep.subr.mxu0 %v3475_v20 }
 0xb0c   :  { %3054 = vmatpush3.msra.mxu1 %v3551_v1  ;;  %3061 = vmatprep.mubr.msk.f32.mxu1 %vm3371_vm3, %v3370_v24 }
 0xb0d   :  { %3055 = vmatprep.subr.mxu1 %v3370_v24 }
 0xb0e   :  { %3056 = vmatpush3.msra.mxu1 %v3557_v3 }
 0xb0f   :  { %3057 = vmatprep.subr.mxu1 %v3370_v24 }
 0xb10   :  { %3058 = vmatpush3.msra.mxu1 %v3566_v4 }
 0xb11   :  { %3059 = vmatprep.subr.mxu1 %v3370_v24 }
 0xb12   :  { %3060 = vmatpush3.msra.mxu1 %v3573_v5 }
 0xb13   :  { %3064 = vmatprep.subr.mxu1 %v3370_v24 }
 0xbc3   :  { %v849_v46 = vpop.f32.mrf.mxu0 }
 0xbc4   :  { %v931_v47 = vadd.f32 %v849_v46, %v3464_v7 }
 0xbc5   :  { %v851_v48 = vpop.f32.mrf.mxu0 }
 0xbc6   :  { %3201 = vtanh.f32 %v931_v47  ;;  %v854_v49 = vadd.f32 %v3527_v35, %v851_v48  ;;  %v2774_v55 = vmul.f32 -1.442695, %v931_v47 }
 0xbcb   :  { %v926_v50 = vpop.f32.mrf.mxu1 }
 0xbcc   :  { %v930_v51 = vadd.f32 %v926_v50, %v854_v49 }
 0xbcd   :  { %v3052_v52 = vpop.f32.mrf.mxu1 }
 0xbce   :  { %3203 = vtanh.f32 %v930_v51  ;;  %v2773_v56 = vmul.f32 -1.442695, %v930_v51 }
 0xbcf   :  { %3205 = vpow2.f32 %v2774_v55 }
 0xbd0   :  { %3207 = vpow2.f32 %v2773_v56 }
 0xbd3   :  { %v3202_v53 = vpop.eup %3201 }
 0xbd4   :  { %965 = vrot.lane.b32.xlu0 %v3202_v53, %s3367_s25 }
 0xbdb   :  { %v3204_v54 = vpop.eup %3203 }
 0xbdc   :  { %941 = vrot.lane.b32.xlu1 %v3204_v54, %s3367_s25  ;;  %v3206_v57 = vpop.eup %3205 }
 0xbdd   :  { %v959_v58 = vadd.f32 1.0, %v3206_v57  ;;  %v3208_v59 = vpop.eup %3207 }
 0xbde   :  { %v935_v60 = vadd.f32 1.0, %v3208_v59 }
 0xbdf   :  { %3209 = vrcp.f32 %v959_v58 }
 0xbe0   :  { %3211 = vrcp.f32 %v935_v60 }
 0xbec   :  { %v3210_v61 = vpop.eup %3209 }
 0xbed   :  { %v3212_v2 = vpop.eup %3211  ;;  %v963_v9 = vmul.f32 %v3210_v61, %v3639_v30 }
 0xbee   :  { %v939_v12 = vmul.f32 %v3212_v2, %v3643_v33 }
 0xc46   :  { %v966_v62 = vpop.permute.xlu0 %965 }
 0xc47   :  { %v968_v63 = vmul.f32 %v3210_v61, %v966_v62 }
 0xc49   :  { %970 = vrot.lane.b32.xlu0 %v968_v63, %s3369_s0 }
 0xc4e   :  { %v942_v6 = vpop.permute.xlu1 %941 }
 0xc4f   :  { %v944_v8 = vmul.f32 %v3212_v2, %v942_v6 }
 0xc51   :  { %946 = vrot.lane.b32.xlu1 %v944_v8, %s3369_s0 }
 0xcbb   :  { %v971_v10 = vpop.permute.xlu0 %970 }
 0xcbc   :  { %v3684_v11 = vadd.f32 %v971_v10, %v963_v9 }
 0xcbe   :  { %3213 = vtanh.f32 %v3684_v11 }
 0xcc3   :  { %v947_v13 = vpop.permute.xlu1 %946 }
 0xcc4   :  { %v3688_v14 = vadd.f32 %v947_v13, %v939_v12 }
 0xcc6   :  { %3215 = vtanh.f32 %v3688_v14 }
 0xccb   :  { %v3214_v15 = vpop.eup %3213 }
 0xccc   :  { %976 = vrot.lane.b32.xlu0 %v3214_v15, %s3367_s25 }
 0xcd3   :  { %v3216_v16 = vpop.eup %3215 }
 0xcd4   :  { %952 = vrot.lane.b32.xlu1 %v3216_v16, %s3367_s25 }
 0xd3e   :  { %v977_v17 = vpop.permute.xlu0 %976 }
 0xd3f   :  { %v979_v18 = vmul.f32 %v3210_v61, %v977_v17 }
 0xd41   :  { %981 = vrot.lane.b32.xlu0 %v979_v18, %s3369_s0 }
 0xd46   :  { %v953_v19 = vpop.permute.xlu1 %952 }
 0xd47   :  { %v955_v29 = vmul.f32 %v3212_v2, %v953_v19 }
 0xd49   :  { %v1773_v30 = vrot.slane %v955_v29, 2  ;;  %1058 = vrot.lane.b32.xlu1 %v955_v29, %s3369_s0 }
 0xd4b   :  { %v3697_v31 = vsel %vm1786_vm6, %v3654_v44, %v1773_v30 }
 0xdb3   :  { %v982_v32 = vpop.permute.xlu0 %981 }
 0xdb4   :  { %2775 = vmatmul.mubr.msk.f32.vlgmr.msra.gmra.mxu0 %vm243_vm2, %v982_v32 }
 0xdb5   :  { %1215 = vmatpush1.msra.mxu0 %v3477_v21  ;;  %1254 = vmatprep.mubr.f32.mxu0 %v3370_v24 }
 0xdb6   :  { %1216 = vmatprep.subr.mxu0 %v3479_v22 }
 0xdb7   :  { %1217 = vmatpush1.msra.mxu0 %v3482_v23 }
 0xdb8   :  { %1218 = vmatprep.subr.mxu0 %v3486_v25 }
 0xdb9   :  { %1219 = vmatpush1.msra.mxu0 %v3490_v26 }
 0xdba   :  { %1220 = vmatprep.subr.mxu0 %v3494_v27 }
 0xdbb   :  { %v1059_v33 = vpop.permute.xlu1 %1058  ;;  %1221 = vmatpush1.msra.mxu0 %v3498_v28 }
 0xdbc   :  { %3062 = vmatmul.mubr.msk.f32.vlgmr.msra.gmra.mxu1 %vm243_vm2, %v1059_v33  ;;  %1418 = vmatprep.subr.mxu0 %v3475_v20 }
 0xdbd   :  { %3065 = vmatpush3.msra.mxu1 %v3551_v1  ;;  %3072 = vmatprep.mubr.msk.f32.mxu1 %vm3371_vm3, %v3370_v24 }
 0xdbe   :  { %3066 = vmatprep.subr.mxu1 %v3370_v24 }
 0xdbf   :  { %3067 = vmatpush3.msra.mxu1 %v3557_v3 }
 0xdc0   :  { %3068 = vmatprep.subr.mxu1 %v3370_v24 }
 0xdc1   :  { %3069 = vmatpush3.msra.mxu1 %v3566_v4 }
 0xdc2   :  { %3070 = vmatprep.subr.mxu1 %v3370_v24 }
 0xdc3   :  { %3071 = vmatpush3.msra.mxu1 %v3573_v5 }
 0xdc4   :  { %3075 = vmatprep.subr.mxu1 %v3370_v24 }
 0xe74   :  { %v1051_v36 = vpop.f32.mrf.mxu0 }
 0xe75   :  { %v1136_v37 = vadd.f32 %v1134_v34, %v1051_v36 }
 0xe76   :  { %v1053_v38 = vpop.f32.mrf.mxu0 }
 0xe77   :  { %3217 = vtanh.f32 %v1136_v37  ;;  %v1056_v39 = vadd.f32 %v3527_v35, %v1053_v38  ;;  %v2778_v45 = vmul.f32 -1.442695, %v1136_v37 }
 0xe7c   :  { %v1128_v40 = vpop.f32.mrf.mxu1 }
 0xe7d   :  { %v1132_v41 = vadd.f32 %v1128_v40, %v1056_v39 }
 0xe7e   :  { %v3063_v42 = vpop.f32.mrf.mxu1 }
 0xe7f   :  { %3219 = vtanh.f32 %v1132_v41  ;;  %v2777_v0 = vmul.f32 -1.442695, %v1132_v41 }
 0xe80   :  { %3221 = vpow2.f32 %v2778_v45 }
 0xe81   :  { %3223 = vpow2.f32 %v2777_v0 }
 0xe84   :  { %v3218_v43 = vpop.eup %3217 }
 0xe85   :  { %1170 = vrot.lane.b32.xlu0 %v3218_v43, %s3367_s25 }
 0xe8c   :  { %v3220_v44 = vpop.eup %3219 }
 0xe8d   :  { %1146 = vrot.lane.b32.xlu1 %v3220_v44, %s3367_s25  ;;  %v3222_v46 = vpop.eup %3221 }
 0xe8e   :  { %v1164_v47 = vadd.f32 1.0, %v3222_v46  ;;  %v3224_v48 = vpop.eup %3223 }
 0xe8f   :  { %v1140_v49 = vadd.f32 1.0, %v3224_v48 }
 0xe90   :  { %3225 = vrcp.f32 %v1164_v47 }
 0xe91   :  { %3227 = vrcp.f32 %v1140_v49 }
 0xe9d   :  { %v3226_v50 = vpop.eup %3225 }
 0xe9e   :  { %v3228_v53 = vpop.eup %3227  ;;  %v1168_v56 = vmul.f32 %v3226_v50, %v3684_v11 }
 0xe9f   :  { %v1144_v59 = vmul.f32 %v3228_v53, %v3688_v14 }
 0xef7   :  { %v1171_v51 = vpop.permute.xlu0 %1170 }
 0xef8   :  { %v1173_v52 = vmul.f32 %v3226_v50, %v1171_v51 }
 0xefa   :  { %1175 = vrot.lane.b32.xlu0 %v1173_v52, %s3369_s0 }
 0xeff   :  { %v1147_v54 = vpop.permute.xlu1 %1146 }
 0xf00   :  { %v1149_v55 = vmul.f32 %v3228_v53, %v1147_v54 }
 0xf02   :  { %1151 = vrot.lane.b32.xlu1 %v1149_v55, %s3369_s0 }
 0xf6c   :  { %v1176_v57 = vpop.permute.xlu0 %1175 }
 0xf6d   :  { %v3727_v58 = vadd.f32 %v1176_v57, %v1168_v56 }
 0xf6f   :  { %3229 = vtanh.f32 %v3727_v58 }
 0xf74   :  { %v1152_v60 = vpop.permute.xlu1 %1151 }
 0xf75   :  { %v3731_v61 = vadd.f32 %v1152_v60, %v1144_v59 }
 0xf77   :  { %3231 = vtanh.f32 %v3731_v61 }
 0xf7c   :  { %v3230_v62 = vpop.eup %3229 }
 0xf7d   :  { %1181 = vrot.lane.b32.xlu0 %v3230_v62, %s3367_s25 }
 0xf84   :  { %v3232_v63 = vpop.eup %3231 }
 0xf85   :  { %1157 = vrot.lane.b32.xlu1 %v3232_v63, %s3367_s25 }
 0xfef   :  { %v1182_v2 = vpop.permute.xlu0 %1181 }
 0xff0   :  { %v1184_v6 = vmul.f32 %v3226_v50, %v1182_v2 }
 0xff2   :  { %1186 = vrot.lane.b32.xlu0 %v1184_v6, %s3369_s0 }
 0xff7   :  { %v1158_v8 = vpop.permute.xlu1 %1157 }
 0xff8   :  { %v3737_v9 = vmul.f32 %v3228_v53, %v1158_v8 }
 0xffa   :  { %1263 = vrot.lane.b32.xlu1 %v3737_v9, %s3369_s0 }
0x1064   :  { %v1187_v10 = vpop.permute.xlu0 %1186 }
0x1065   :  { %2779 = vmatmul.mubr.msk.f32.vlgmr.msra.gmra.mxu0 %vm243_vm2, %v1187_v10 }
0x1066   :  { %1419 = vmatpush1.msra.mxu0 %v3477_v21  ;;  %1458 = vmatprep.mubr.f32.mxu0 %v3370_v24 }
0x1067   :  { %1420 = vmatprep.subr.mxu0 %v3479_v22 }
0x1068   :  { %1421 = vmatpush1.msra.mxu0 %v3482_v23 }
0x1069   :  { %1422 = vmatprep.subr.mxu0 %v3486_v25 }
0x106a   :  { %1423 = vmatpush1.msra.mxu0 %v3490_v26 }
0x106b   :  { %1424 = vmatprep.subr.mxu0 %v3494_v27 }
0x106c   :  { %v1264_v11 = vpop.permute.xlu1 %1263  ;;  %1425 = vmatpush1.msra.mxu0 %v3498_v28 }
0x106d   :  { %3073 = vmatmul.mubr.msk.f32.vlgmr.msra.gmra.mxu1 %vm243_vm2, %v1264_v11  ;;  %1622 = vmatprep.subr.mxu0 %v3475_v20  ;;  %v1338_v20 = vrot.slane %v3464_v7, 4 }
0x106e   :  { %3076 = vmatpush3.msra.mxu1 %v3551_v1  ;;  %3083 = vmatprep.mubr.msk.f32.mxu1 %vm3371_vm3, %v3370_v24 }
0x106f   :  { %3077 = vmatprep.subr.mxu1 %v3370_v24 }
0x1070   :  { %3078 = vmatpush3.msra.mxu1 %v3557_v3 }
0x1071   :  { %3079 = vmatprep.subr.mxu1 %v3370_v24 }
0x1072   :  { %3080 = vmatpush3.msra.mxu1 %v3566_v4 }
0x1073   :  { %3081 = vmatprep.subr.mxu1 %v3370_v24 }
0x1074   :  { %3082 = vmatpush3.msra.mxu1 %v3573_v5 }
0x1075   :  { %3086 = vmatprep.subr.mxu1 %v3370_v24 }
0x1125   :  { %v1256_v12 = vpop.f32.mrf.mxu0 }
0x1126   :  { %v1340_v13 = vadd.f32 %v1338_v20, %v1256_v12 }
0x1127   :  { %v1258_v14 = vpop.f32.mrf.mxu0 }
0x1128   :  { %3233 = vtanh.f32 %v1340_v13  ;;  %v1261_v15 = vadd.f32 %v3527_v35, %v1258_v14  ;;  %v2782_v30 = vmul.f32 -1.442695, %v1340_v13 }
0x112d   :  { %v1333_v16 = vpop.f32.mrf.mxu1 }
0x112e   :  { %v1337_v17 = vadd.f32 %v1333_v16, %v1261_v15 }
0x112f   :  { %v3074_v18 = vpop.f32.mrf.mxu1 }
0x1130   :  { %3235 = vtanh.f32 %v1337_v17  ;;  %v2781_v32 = vmul.f32 -1.442695, %v1337_v17 }
0x1131   :  { %3237 = vpow2.f32 %v2782_v30 }
0x1132   :  { %3239 = vpow2.f32 %v2781_v32 }
0x1135   :  { %v3234_v19 = vpop.eup %3233 }
0x1136   :  { %1374 = vrot.lane.b32.xlu0 %v3234_v19, %s3367_s25 }
0x113d   :  { %v3236_v29 = vpop.eup %3235 }
0x113e   :  { %1350 = vrot.lane.b32.xlu1 %v3236_v29, %s3367_s25  ;;  %v3238_v33 = vpop.eup %3237 }
0x113f   :  { %v1368_v34 = vadd.f32 1.0, %v3238_v33  ;;  %v3240_v36 = vpop.eup %3239 }
0x1140   :  { %v1344_v37 = vadd.f32 1.0, %v3240_v36 }
0x1141   :  { %3241 = vrcp.f32 %v1368_v34 }
0x1142   :  { %3243 = vrcp.f32 %v1344_v37 }
0x114e   :  { %v3242_v38 = vpop.eup %3241 }
0x114f   :  { %v3244_v41 = vpop.eup %3243  ;;  %v1372_v44 = vmul.f32 %v3242_v38, %v3727_v58 }
0x1150   :  { %v1348_v46 = vmul.f32 %v3244_v41, %v3731_v61 }
0x11a8   :  { %v1375_v39 = vpop.permute.xlu0 %1374 }
0x11a9   :  { %v1377_v40 = vmul.f32 %v3242_v38, %v1375_v39 }
0x11ab   :  { %1379 = vrot.lane.b32.xlu0 %v1377_v40, %s3369_s0 }
0x11b0   :  { %v1351_v42 = vpop.permute.xlu1 %1350 }
0x11b1   :  { %v1353_v43 = vmul.f32 %v3244_v41, %v1351_v42 }
0x11b3   :  { %1355 = vrot.lane.b32.xlu1 %v1353_v43, %s3369_s0  ;;  %v1816_v43 = vld [vmem:[#allocation6 + $0xc8] sm:$0xff] }
0x121d   :  { %v1380_v45 = vpop.permute.xlu0 %1379 }
0x121e   :  { %v3769_v0 = vadd.f32 %v1380_v45, %v1372_v44  ;;  %v1818_v44 = vld [vmem:[#allocation6 + $0xd8] sm:$0xff]  ;;  %v1815_v45 = vld [vmem:[#allocation6 + $0xc0] sm:$0xff] }
0x1220   :  { %3245 = vtanh.f32 %v3769_v0 }
0x1225   :  { %v1356_v47 = vpop.permute.xlu1 %1355 }
0x1226   :  { %v3773_v48 = vadd.f32 %v1356_v47, %v1348_v46  ;;  %v1808_v46 = vld [vmem:[#allocation6 + $0x88] sm:$0xff]  ;;  %v1810_v47 = vld [vmem:[#allocation6 + $0x98] sm:$0xff] }
0x1228   :  { %3247 = vtanh.f32 %v3773_v48 }
0x122d   :  { %v3246_v49 = vpop.eup %3245 }
0x122e   :  { %1385 = vrot.lane.b32.xlu0 %v3246_v49, %s3367_s25  ;;  %v1809_v49 = vld [vmem:[#allocation6 + $0x90] sm:$0xff] }
0x1235   :  { %v3248_v50 = vpop.eup %3247 }
0x1236   :  { %1361 = vrot.lane.b32.xlu1 %v3248_v50, %s3367_s25 }
0x12a0   :  { %v1386_v51 = vpop.permute.xlu0 %1385 }
0x12a1   :  { %v1388_v52 = vmul.f32 %v3242_v38, %v1386_v51 }
0x12a3   :  { %1390 = vrot.lane.b32.xlu0 %v1388_v52, %s3369_s0 }
0x12a8   :  { %v1362_v53 = vpop.permute.xlu1 %1361 }
0x12a9   :  { %v3779_v54 = vmul.f32 %v3244_v41, %v1362_v53  ;;  %v1800_v53 = vld [vmem:[#allocation6 + $0x48] sm:$0xff] }
0x12ab   :  { %1467 = vrot.lane.b32.xlu1 %v3779_v54, %s3369_s0  ;;  %v1775_v19 = vrot.slane %v3779_v54, 6  ;;  %v1802_v54 = vld [vmem:[#allocation6 + $0x58] sm:$0xff] }
0x12ad   :  { %v1788_v33 = vsel %vm1782_vm4, %v3737_v9, %v1775_v19 }
0x1315   :  { %v1391_v55 = vpop.permute.xlu0 %1390 }
0x1316   :  { %2783 = vmatmul.mubr.msk.f32.vlgmr.msra.gmra.mxu0 %vm243_vm2, %v1391_v55  ;;  %v1799_v55 = vld [vmem:[#allocation6 + $0x40] sm:$0xff] }
0x1317   :  { %1623 = vmatpush1.msra.mxu0 %v3477_v21  ;;  %1662 = vmatprep.mubr.f32.mxu0 %v3370_v24  ;;  %v1542_v21 = vrot.slane %v3464_v7, 6 }
0x1318   :  { %1624 = vmatprep.subr.mxu0 %v3479_v22 }
0x1319   :  { %1625 = vmatpush1.msra.mxu0 %v3482_v23 }
0x131a   :  { %1626 = vmatprep.subr.mxu0 %v3486_v25 }
0x131b   :  { %1627 = vmatpush1.msra.mxu0 %v3490_v26 }
0x131c   :  { %1628 = vmatprep.subr.mxu0 %v3494_v27 }
0x131d   :  { %v1468_v56 = vpop.permute.xlu1 %1467  ;;  %1629 = vmatpush1.msra.mxu0 %v3498_v28 }
0x131e   :  { %3084 = vmatmul.mubr.msk.f32.vlgmr.msra.gmra.mxu1 %vm243_vm2, %v1468_v56  ;;  %1899 = vmatprep.subr.mxu0 %v1816_v43  ;;  %v1801_v56 = vld [vmem:[#allocation6 + $0x50] sm:$0xff] }
0x131f   :  { %3087 = vmatpush3.msra.mxu1 %v3551_v1  ;;  %3094 = vmatprep.mubr.msk.f32.mxu1 %vm3371_vm3, %v3370_v24  ;;  %v2229_v43 = vld [vmem:[#allocation7 + $0xf0] sm:$0xff] }
0x1320   :  { %3088 = vmatprep.subr.mxu1 %v3370_v24 }
0x1321   :  { %3089 = vmatpush3.msra.mxu1 %v3557_v3 }
0x1322   :  { %3090 = vmatprep.subr.mxu1 %v3370_v24 }
0x1323   :  { %3091 = vmatpush3.msra.mxu1 %v3566_v4 }
0x1324   :  { %3092 = vmatprep.subr.mxu1 %v3370_v24 }
0x1325   :  { %3093 = vmatpush3.msra.mxu1 %v3573_v5 }
0x1326   :  { %1976 = vmatprep.subr.mxu1 %v1818_v44  ;;  %v2261_v44 = vld [vmem:[#allocation7 + $0x1f0] sm:$0xff] }
0x13d6   :  { %v1460_v22 = vpop.f32.mrf.mxu0 }
0x13d7   :  { %v1544_v23 = vadd.f32 %v1542_v21, %v1460_v22  ;;  %v1792_v21 = vld [vmem:[#allocation6 + $0x8] sm:$0xff]  ;;  %v1794_v22 = vld [vmem:[#allocation6 + $0x18] sm:$0xff] }
0x13d8   :  { %v1462_v25 = vpop.f32.mrf.mxu0 }
0x13d9   :  { %3249 = vtanh.f32 %v1544_v23  ;;  %v1465_v26 = vadd.f32 %v3527_v35, %v1462_v25  ;;  %v2786_v57 = vmul.f32 -1.442695, %v1544_v23  ;;  %v1791_v23 = vld [vmem:[#allocation6] sm:$0xff]  ;;  %v1793_v25 = vld [vmem:[#allocation6 + $0x10] sm:$0xff] }
0x13de   :  { %v1537_v27 = vpop.f32.mrf.mxu1 }
0x13df   :  { %v1541_v28 = vadd.f32 %v1537_v27, %v1465_v26 }
0x13e0   :  { %v3085_v1 = vpop.f32.mrf.mxu1 }
0x13e1   :  { %3251 = vtanh.f32 %v1541_v28  ;;  %v2785_v5 = vmul.f32 -1.442695, %v1541_v28 }
0x13e2   :  { %3253 = vpow2.f32 %v2786_v57 }
0x13e3   :  { %3255 = vpow2.f32 %v2785_v5 }
0x13e6   :  { %v3250_v3 = vpop.eup %3249 }
0x13e7   :  { %1578 = vrot.lane.b32.xlu0 %v3250_v3, %s3367_s25 }
0x13ee   :  { %v3252_v4 = vpop.eup %3251 }
0x13ef   :  { %1554 = vrot.lane.b32.xlu1 %v3252_v4, %s3367_s25  ;;  %v3254_v7 = vpop.eup %3253 }
0x13f0   :  { %v1572_v58 = vadd.f32 1.0, %v3254_v7  ;;  %v3256_v59 = vpop.eup %3255  ;;  %v1822_v7 = vld [vmem:[#allocation6 + $0xf8] sm:$0xff] }
0x13f1   :  { %v1548_v60 = vadd.f32 1.0, %v3256_v59  ;;  %v1821_v59 = vld [vmem:[#allocation6 + $0xf0] sm:$0xff] }
0x13f2   :  { %3257 = vrcp.f32 %v1572_v58  ;;  %v1819_v58 = vld [vmem:[#allocation6 + $0xe0] sm:$0xff] }
0x13f3   :  { %3259 = vrcp.f32 %v1548_v60  ;;  %v1812_v60 = vld [vmem:[#allocation6 + $0xa8] sm:$0xff] }
0x13ff   :  { %v3258_v61 = vpop.eup %3257 }
0x1400   :  { %v3260_v2 = vpop.eup %3259  ;;  %v1576_v10 = vmul.f32 %v3258_v61, %v3769_v0  ;;  %v1817_v0 = vld [vmem:[#allocation6 + $0xd0] sm:$0xff] }
0x1401   :  { %v1552_v12 = vmul.f32 %v3260_v2, %v3773_v48  ;;  %v1807_v48 = vld [vmem:[#allocation6 + $0x80] sm:$0xff] }
0x1459   :  { %v1579_v62 = vpop.permute.xlu0 %1578 }
0x145a   :  { %v1581_v63 = vmul.f32 %v3258_v61, %v1579_v62  ;;  %v1811_v62 = vld [vmem:[#allocation6 + $0xa0] sm:$0xff] }
0x145c   :  { %1583 = vrot.lane.b32.xlu0 %v1581_v63, %s3369_s0  ;;  %v1813_v63 = vld [vmem:[#allocation6 + $0xb0] sm:$0xff] }
0x1461   :  { %v1555_v6 = vpop.permute.xlu1 %1554 }
0x1462   :  { %v1557_v8 = vmul.f32 %v3260_v2, %v1555_v6  ;;  %v1806_v6 = vld [vmem:[#allocation6 + $0x78] sm:$0xff] }
0x1464   :  { %1559 = vrot.lane.b32.xlu1 %v1557_v8, %s3369_s0  ;;  %v1803_v8 = vld [vmem:[#allocation6 + $0x60] sm:$0xff] }
0x14ce   :  { %v1584_v11 = vpop.permute.xlu0 %1583 }
0x14cf   :  { %v1586_v20 = vadd.f32 %v1584_v11, %v1576_v10  ;;  %v1805_v10 = vld [vmem:[#allocation6 + $0x70] sm:$0xff]  ;;  %v1796_v11 = vld [vmem:[#allocation6 + $0x28] sm:$0xff] }
0x14d1   :  { %3261 = vtanh.f32 %v1586_v20  ;;  %v1798_v20 = vld [vmem:[#allocation6 + $0x38] sm:$0xff] }
0x14d6   :  { %v1560_v13 = vpop.permute.xlu1 %1559 }
0x14d7   :  { %v3810_v14 = vadd.f32 %v1560_v13, %v1552_v12  ;;  %v1795_v12 = vld [vmem:[#allocation6 + $0x20] sm:$0xff]  ;;  %v1797_v13 = vld [vmem:[#allocation6 + $0x30] sm:$0xff] }
0x14d9   :  { %3263 = vtanh.f32 %v3810_v14 }
0x14de   :  { %v3262_v15 = vpop.eup %3261 }
0x14df   :  { %1589 = vrot.lane.b32.xlu0 %v3262_v15, %s3367_s25  ;;  %v2262_v15 = vld [vmem:[#allocation7 + $0x1f8] sm:$0xff] }
0x14e6   :  { %v3264_v16 = vpop.eup %3263 }
0x14e7   :  { %1565 = vrot.lane.b32.xlu1 %v3264_v16, %s3367_s25 }
0x1551   :  { %v1590_v17 = vpop.permute.xlu0 %1589 }
0x1552   :  { %v1592_v18 = vmul.f32 %v3258_v61, %v1590_v17  ;;  %v1814_v61 = vld [vmem:[#allocation6 + $0xb8] sm:$0xff] }
0x1554   :  { %1594 = vrot.lane.b32.xlu0 %v1592_v18, %s3369_s0 }
0x1559   :  { %v1566_v29 = vpop.permute.xlu1 %1565 }
0x155a   :  { %v1568_v30 = vmul.f32 %v3260_v2, %v1566_v29  ;;  %v1804_v2 = vld [vmem:[#allocation6 + $0x68] sm:$0xff]  ;;  %v1825_v29 = vlaneseq }
0x155c   :  { %v1777_v32 = vrot.slane %v1568_v30, 4  ;;  %1670 = vrot.lane.b32.xlu1 %v1568_v30, %s3369_s0  ;;  %v3845_v30 = vshrl.u32 %v1825_v29, 7  ;;  %v2218_v29 = vld [vmem:[#allocation7 + $0x98] sm:$0xff] }
0x155e   :  { %v3821_v34 = vsel %vm1784_vm5, %v1788_v33, %v1777_v32  ;;  %v1831_v32 = vsub.s32 1, %v3845_v30 }
0x15c6   :  { %v1595_v36 = vpop.permute.xlu0 %1594 }
0x15c7   :  { %2787 = vmatmul.mubr.msk.f32.vlgmr.msra.gmra.mxu0 %vm243_vm2, %v1595_v36  ;;  %v1839_v36 = vsub.s32 3, %v3845_v30 }
0x15c8   :  { %1939 = vmatprep.mubr.f32.mxu0 %v3370_v24  ;;  %1900 = vmatpush1.msra.mxu0 %v1815_v45 }
0x15c9   :  { %1901 = vmatprep.subr.mxu0 %v1808_v46  ;;  %v2245_v46 = vld [vmem:[#allocation7 + $0x170] sm:$0xff] }
0x15ca   :  { %1902 = vmatpush1.msra.mxu0 %v1807_v48  ;;  %v2228_v48 = vld [vmem:[#allocation7 + $0xe8] sm:$0xff] }
0x15cb   :  { %1903 = vmatprep.subr.mxu0 %v1800_v53 }
0x15cc   :  { %1904 = vmatpush1.msra.mxu0 %v1799_v55 }
0x15cd   :  { %1905 = vmatprep.subr.mxu0 %v1792_v21  ;;  %v2243_v21 = vld [vmem:[#allocation7 + $0x160] sm:$0xff] }
0x15ce   :  { %v1671_v37 = vpop.permute.xlu1 %1670  ;;  %1906 = vmatpush1.msra.mxu0 %v1791_v23  ;;  %v2210_v23 = vld [vmem:[#allocation7 + $0x58] sm:$0xff] }
0x15cf   :  { %3095 = vmatmul.mubr.msk.f32.vlgmr.msra.gmra.mxu1 %vm243_vm2, %v1671_v37 }
0x15d0   :  { %2016 = vmatprep.mubr.f32.mxu1 %v3370_v24  ;;  %1977 = vmatpush1.msra.mxu1 %v1817_v0  ;;  %v2213_v0 = vld [vmem:[#allocation7 + $0x70] sm:$0xff] }
0x15d1   :  { %1978 = vmatprep.subr.mxu1 %v1810_v47 }
0x15d2   :  { %1979 = vmatpush1.msra.mxu1 %v1809_v49  ;;  %v2260_v49 = vld [vmem:[#allocation7 + $0x1e8] sm:$0xff] }
0x15d3   :  { %1980 = vmatprep.subr.mxu1 %v1802_v54  ;;  %v2259_v54 = vld [vmem:[#allocation7 + $0x1e0] sm:$0xff] }
0x15d4   :  { %1981 = vmatpush1.msra.mxu1 %v1801_v56  ;;  %v2211_v56 = vld [vmem:[#allocation7 + $0x60] sm:$0xff] }
0x15d5   :  { %1982 = vmatprep.subr.mxu1 %v1794_v22  ;;  %v2226_v22 = vld [vmem:[#allocation7 + $0xd8] sm:$0xff] }
0x15d6   :  { %1983 = vmatpush1.msra.mxu1 %v1793_v25  ;;  %v2242_v25 = vld [vmem:[#allocation7 + $0x158] sm:$0xff] }
0x15d7   :  { %2130 = vmatprep.subr.mxu1 %v1822_v7  ;;  %v2255_v7 = vld [vmem:[#allocation7 + $0x1c0] sm:$0xff] }
0x1687   :  { %v1664_v38 = vpop.f32.mrf.mxu0 }
0x1689   :  { %v1665_v39 = vpop.f32.mrf.mxu0 }
0x168a   :  { %v1668_v40 = vadd.f32 %v3527_v35, %v1665_v39 }
0x168f   :  { %v1740_v41 = vpop.f32.mrf.mxu1 }
0x1690   :  { %v1744_v42 = vadd.f32 %v1740_v41, %v1668_v40  ;;  %v2214_v40 = vld [vmem:[#allocation7 + $0x78] sm:$0xff] }
0x1691   :  { %v3096_v9 = vpop.f32.mrf.mxu1  ;;  %v2246_v41 = vld [vmem:[#allocation7 + $0x178] sm:$0xff] }
0x1692   :  { %3265 = vtanh.f32 %v1744_v42  ;;  %v2789_v50 = vmul.f32 -1.442695, %v1744_v42 }
0x1694   :  { %3267 = vpow2.f32 %v2789_v50  ;;  %v2212_v50 = vld [vmem:[#allocation7 + $0x68] sm:$0xff] }
0x169f   :  { %v3266_v35 = vpop.eup %3265 }
0x16a0   :  { %1754 = vrot.lane.b32.xlu0 %v3266_v35, %s3367_s25 }
0x16a1   :  { %v3268_v51 = vpop.eup %3267 }
0x16a2   :  { %v1748_v52 = vadd.f32 1.0, %v3268_v51  ;;  %v2244_v51 = vld [vmem:[#allocation7 + $0x168] sm:$0xff] }
0x16a4   :  { %3269 = vrcp.f32 %v1748_v52  ;;  %v2227_v52 = vld [vmem:[#allocation7 + $0xe0] sm:$0xff] }
0x16b1   :  { %v3270_v26 = vpop.eup %3269 }
0x16b2   :  { %v1752_v1 = vmul.f32 %v3270_v26, %v3810_v14  ;;  %v2230_v14 = vld [vmem:[#allocation7 + $0xf8] sm:$0xff] }
0x1712   :  { %v1755_v27 = vpop.permute.xlu0 %1754 }
0x1713   :  { %v1757_v28 = vmul.f32 %v3270_v26, %v1755_v27  ;;  %v2257_v27 = vld [vmem:[#allocation7 + $0x1d0] sm:$0xff] }
0x1715   :  { %1759 = vrot.lane.b32.xlu1 %v1757_v28, %s3369_s0  ;;  %v2209_v28 = vld [vmem:[#allocation7 + $0x50] sm:$0xff] }
0x1719   :  { %1867 = vrot.lane.b32.xlu1 %v3697_v31, %s3369_s0  ;;  %v1820_v31 = vld [vmem:[#allocation6 + $0xe8] sm:$0xff] }
0x171a   :  { %2053 = vmatprep.subr.mxu0 %v1820_v31  ;;  %v2223_v31 = vld [vmem:[#allocation7 + $0xc0] sm:$0xff] }
0x1787   :  { %v1760_v3 = vpop.permute.xlu1 %1759 }
0x1788   :  { %v1762_v4 = vadd.f32 %v1760_v3, %v1752_v1  ;;  %v2241_v1 = vld [vmem:[#allocation7 + $0x150] sm:$0xff]  ;;  %v2224_v3 = vld [vmem:[#allocation7 + $0xc8] sm:$0xff] }
0x178a   :  { %3271 = vtanh.f32 %v1762_v4  ;;  %v2256_v4 = vld [vmem:[#allocation7 + $0x1c8] sm:$0xff] }
0x178b   :  { %v3833_v57 = vpop.permute.xlu1 %1867 }
0x178c   :  { %2790 = vmatmul.mubr.msk.f32.vlgmr.msra.gmra.mxu0 %vm243_vm2, %v3833_v57  ;;  %2792 = vmatmul.mubr.msk.f32.vlgmr.msra.gmra.mxu1 %vm243_vm2, %v3833_v57 }
0x178d   :  { %1945 = vmatprep.mubr.f32.mxu0 %v3370_v24  ;;  %2022 = vmatprep.mubr.f32.mxu1 %v3370_v24 }
0x178e   :  { %2054 = vmatpush1.msra.mxu0 %v1819_v58  ;;  %2131 = vmatpush1.msra.mxu1 %v1821_v59  ;;  %v2207_v58 = vld [vmem:[#allocation7 + $0x40] sm:$0xff] }
0x178f   :  { %2055 = vmatprep.subr.mxu0 %v1812_v60  ;;  %2132 = vmatprep.subr.mxu1 %v1814_v61  ;;  %v2239_v59 = vld [vmem:[#allocation7 + $0x140] sm:$0xff]  ;;  %v2222_v60 = vld [vmem:[#allocation7 + $0xb8] sm:$0xff] }
0x1790   :  { %2056 = vmatpush1.msra.mxu0 %v1811_v62  ;;  %2133 = vmatpush1.msra.mxu1 %v1813_v63  ;;  %v2254_v61 = vld [vmem:[#allocation7 + $0x1b8] sm:$0xff] }
0x1791   :  { %2057 = vmatprep.subr.mxu0 %v1804_v2  ;;  %2134 = vmatprep.subr.mxu1 %v1806_v6  ;;  %v2206_v62 = vld [vmem:[#allocation7 + $0x38] sm:$0xff]  ;;  %v2221_v2 = vld [vmem:[#allocation7 + $0xb0] sm:$0xff] }
0x1792   :  { %2058 = vmatpush1.msra.mxu0 %v1803_v8  ;;  %2135 = vmatpush1.msra.mxu1 %v1805_v10  ;;  %v2238_v63 = vld [vmem:[#allocation7 + $0x138] sm:$0xff]  ;;  %v2253_v6 = vld [vmem:[#allocation7 + $0x1b0] sm:$0xff] }
0x1793   :  { %2059 = vmatprep.subr.mxu0 %v1796_v11  ;;  %2136 = vmatprep.subr.mxu1 %v1798_v20  ;;  %v2205_v8 = vld [vmem:[#allocation7 + $0x30] sm:$0xff]  ;;  %v2220_v11 = vld [vmem:[#allocation7 + $0xa8] sm:$0xff] }
0x1794   :  { %2060 = vmatpush1.msra.mxu0 %v1795_v12  ;;  %2137 = vmatpush1.msra.mxu1 %v1797_v13  ;;  %v2237_v10 = vld [vmem:[#allocation7 + $0x130] sm:$0xff]  ;;  %v2252_v20 = vld [vmem:[#allocation7 + $0x1a8] sm:$0xff]  ;;  %v1827_v12 = vsub.s32 0, %v3845_v30  ;;  %v1835_v13 = vsub.s32 2, %v3845_v30 }
0x1795   :  { %2841 = vmatprep.subr.mxu0 %v2230_v14  ;;  %2879 = vmatprep.subr.mxu1 %v2262_v15  ;;  %v2204_v14 = vld [vmem:[#allocation7 + $0x28] sm:$0xff] }
0x1796   :  { %v2236_v15 = vld [vmem:[#allocation7 + $0x128] sm:$0xff] }
0x1797   :  { %v3272_v5 = vpop.eup %3271 }
0x1798   :  { %1765 = vrot.lane.b32.xlu0 %v3272_v5, %s3367_s25  ;;  %v2240_v5 = vld [vmem:[#allocation7 + $0x148] sm:$0xff] }
0x180a   :  { %v1766_v16 = vpop.permute.xlu0 %1765 }
0x180b   :  { %v1768_v17 = vmul.f32 %v3270_v26, %v1766_v16  ;;  %v2225_v26 = vld [vmem:[#allocation7 + $0xd0] sm:$0xff]  ;;  %v2219_v16 = vld [vmem:[#allocation7 + $0xa0] sm:$0xff] }
0x180d   :  { %v1780_v18 = vrot.slane %v1768_v17, 2  ;;  %v2251_v17 = vld [vmem:[#allocation7 + $0x1a0] sm:$0xff] }
0x180f   :  { %v1790_v19 = vsel %vm1786_vm6, %v3821_v34, %v1780_v18  ;;  %v3858_v34 = vld [vmem:[%s3972_s7] sm:$0xff]  ;;  %v2203_v18 = vld [vmem:[#allocation7 + $0x20] sm:$0xff] }
0x1810   :  { %1869 = vrot.lane.b32.xlu0 %v1790_v19, %s3369_s0  ;;  %v3863_v39 = vrot.slane %v3858_v34, %v1831_v32  ;;  %v3866_v9 = vrot.slane %v3858_v34, %v1839_v36  ;;  %v2235_v19 = vld [vmem:[#allocation7 + $0x120] sm:$0xff]  ;;  %v2250_v32 = vld [vmem:[#allocation7 + $0x198] sm:$0xff]  ;;  %v3881_v36 = vrot.slane %v3858_v34, %v1827_v12 }
0x1811   :  { %v2271_v12 = vld [vmem:[#allocation7 + $0x240] sm:$0xff] }
0x184c   :  { %v3848_v33 = vpop.f32.mrf.mxu0  ;;  %v3851_v38 = vpop.f32.mrf.mxu1 }
0x184e   :  { %v1943_v42 = vpop.f32.mrf.mxu0  ;;  %v2020_v45 = vpop.f32.mrf.mxu1 }
0x184f   :  { %v1944_v47 = vadd.f32 %v1943_v42, %v3863_v39  ;;  %v2021_v35 = vadd.f32 %v2020_v45, %v3866_v9  ;;  %v2217_v42 = vld [vmem:[#allocation7 + $0x90] sm:$0xff] }
0x1850   :  { %v2233_v45 = vld [vmem:[#allocation7 + $0x110] sm:$0xff] }
0x1851   :  { %v2184_v53 = vmax.f32 %v1944_v47, 0.0  ;;  %v2186_v55 = vmax.f32 %v2021_v35, 0.0  ;;  %v1942_v47 = vadd.f32 %v3848_v33, %v3881_v36  ;;  %v2232_v35 = vld [vmem:[#allocation7 + $0x108] sm:$0xff]  ;;  %v2294_v33 = vld [vmem:[#allocation7 + $0x2f8] sm:$0xff] }
0x1882   :  { %v1870_v37 = vpop.permute.xlu0 %1869 }
0x1883   :  { %2791 = vmatmul.mubr.msk.f32.gmra.mxu0 %vm243_vm2, %v1870_v37  ;;  %2793 = vmatmul.mubr.msk.f32.gmra.mxu1 %vm243_vm2, %v1870_v37 }
0x1884   :  { %2093 = vmatprep.mubr.f32.mxu0 %v3370_v24  ;;  %2170 = vmatprep.mubr.f32.mxu1 %v3370_v24 }
0x1887   :  { %2794 = vmatmul.mubr.msk.f32.vlgmr.msra.gmra.mxu0 %vm243_vm2, %v3833_v57  ;;  %2796 = vmatmul.mubr.msk.f32.vlgmr.msra.gmra.mxu1 %vm243_vm2, %v3833_v57  ;;  %v2208_v57 = vld [vmem:[#allocation7 + $0x48] sm:$0xff] }
0x1888   :  { %2842 = vmatpush3.msra.mxu0 %v2214_v40  ;;  %2880 = vmatpush3.msra.mxu1 %v2246_v41  ;;  %v2202_v40 = vld [vmem:[#allocation7 + $0x18] sm:$0xff] }
0x1889   :  { %2843 = vmatprep.subr.mxu0 %v2229_v43  ;;  %2881 = vmatprep.subr.mxu1 %v2261_v44  ;;  %v2234_v41 = vld [vmem:[#allocation7 + $0x118] sm:$0xff]  ;;  %v2249_v43 = vld [vmem:[#allocation7 + $0x190] sm:$0xff] }
0x188a   :  { %2844 = vmatpush3.msra.mxu0 %v2213_v0  ;;  %2882 = vmatpush3.msra.mxu1 %v2245_v46  ;;  %v2201_v44 = vld [vmem:[#allocation7 + $0x10] sm:$0xff]  ;;  %v2216_v0 = vld [vmem:[#allocation7 + $0x88] sm:$0xff] }
0x188b   :  { %2099 = vmatprep.mubr.f32.mxu0 %v3370_v24  ;;  %2176 = vmatprep.mubr.f32.mxu1 %v3370_v24  ;;  %v2258_v24 = vld [vmem:[#allocation7 + $0x1d8] sm:$0xff]  ;;  %v2248_v46 = vld [vmem:[#allocation7 + $0x188] sm:$0xff] }
0x188c   :  { %2845 = vmatprep.subr.mxu0 %v2228_v48  ;;  %2883 = vmatprep.subr.mxu1 %v2260_v49  ;;  %v2200_v49 = vld [vmem:[#allocation7 + $0x8] sm:$0xff] }
0x188d   :  { %2795 = vmatmul.mubr.msk.f32.gmra.mxu0 %vm243_vm2, %v1870_v37  ;;  %2797 = vmatmul.mubr.msk.f32.gmra.mxu1 %vm243_vm2, %v1870_v37  ;;  %v3884_v37 = vrot.slane %v3858_v34, %v1835_v13  ;;  %v2303_v13 = vld [vmem:[#allocation7 + $0x340] sm:$0xff] }
0x188e   :  { %2846 = vmatpush3.msra.mxu0 %v2212_v50  ;;  %2884 = vmatpush3.msra.mxu1 %v2244_v51  ;;  %v2215_v50 = vld [vmem:[#allocation7 + $0x80] sm:$0xff] }
0x188f   :  { %2847 = vmatprep.subr.mxu0 %v2227_v52  ;;  %2398 = vmatprep.mubr.f32.mxu0 %v2184_v53  ;;  %v2019_v48 = vadd.f32 %v3851_v38, %v3884_v37  ;;  %v2247_v51 = vld [vmem:[#allocation7 + $0x180] sm:$0xff]  ;;  %v2326_v38 = vld [vmem:[#allocation7 + $0x3f8] sm:$0xff] }
0x1890   :  { %2885 = vmatprep.subr.mxu1 %v2259_v54  ;;  %2473 = vmatprep.mubr.f32.mxu1 %v2186_v55  ;;  %v2199_v52 = vld [vmem:[#allocation7] sm:$0xff]  ;;  %v2183_v54 = vmax.f32 %v1942_v47, 0.0  ;;  %v2282_v47 = vld [vmem:[#allocation7 + $0x298] sm:$0xff] }
0x1891   :  { %2848 = vmatpush3.msra.mxu0 %v2211_v56  ;;  %2886 = vmatpush3.msra.mxu1 %v2243_v21  ;;  %v2231_v53 = vld [vmem:[#allocation7 + $0x100] sm:$0xff]  ;;  %v2185_v55 = vmax.f32 %v2019_v48, 0.0  ;;  %v2278_v56 = vld [vmem:[#allocation7 + $0x278] sm:$0xff] }
0x1892   :  { %2849 = vmatprep.subr.mxu0 %v2226_v22  ;;  %2887 = vmatprep.subr.mxu1 %v2258_v24  ;;  %v2310_v21 = vld [vmem:[#allocation7 + $0x378] sm:$0xff]  ;;  %v2293_v22 = vld [vmem:[#allocation7 + $0x2f0] sm:$0xff] }
0x1893   :  { %2850 = vmatpush3.msra.mxu0 %v2210_v23  ;;  %2888 = vmatpush3.msra.mxu1 %v2242_v25  ;;  %v2325_v24 = vld [vmem:[#allocation7 + $0x3f0] sm:$0xff]  ;;  %v2314_v48 = vld [vmem:[#allocation7 + $0x398] sm:$0xff] }
0x1894   :  { %2851 = vmatprep.subr.mxu0 %v2225_v26  ;;  %2889 = vmatprep.subr.mxu1 %v2257_v27  ;;  %v2277_v23 = vld [vmem:[#allocation7 + $0x270] sm:$0xff]  ;;  %v2292_v26 = vld [vmem:[#allocation7 + $0x2e8] sm:$0xff] }
0x1895   :  { %2852 = vmatpush3.msra.mxu0 %v2209_v28  ;;  %2890 = vmatpush3.msra.mxu1 %v2241_v1  ;;  %v2309_v25 = vld [vmem:[#allocation7 + $0x370] sm:$0xff]  ;;  %v2324_v27 = vld [vmem:[#allocation7 + $0x3e8] sm:$0xff] }
0x1896   :  { %2853 = vmatprep.subr.mxu0 %v2224_v3  ;;  %2891 = vmatprep.subr.mxu1 %v2256_v4  ;;  %v2276_v28 = vld [vmem:[#allocation7 + $0x268] sm:$0xff]  ;;  %v2291_v3 = vld [vmem:[#allocation7 + $0x2e0] sm:$0xff] }
0x1897   :  { %2854 = vmatpush3.msra.mxu0 %v2208_v57  ;;  %2892 = vmatpush3.msra.mxu1 %v2240_v5  ;;  %v2308_v1 = vld [vmem:[#allocation7 + $0x368] sm:$0xff]  ;;  %v2323_v4 = vld [vmem:[#allocation7 + $0x3e0] sm:$0xff] }
0x1898   :  { %2855 = vmatprep.subr.mxu0 %v2223_v31  ;;  %2893 = vmatprep.subr.mxu1 %v2255_v7  ;;  %v2275_v57 = vld [vmem:[#allocation7 + $0x260] sm:$0xff]  ;;  %v2290_v31 = vld [vmem:[#allocation7 + $0x2d8] sm:$0xff] }
0x1899   :  { %2856 = vmatpush3.msra.mxu0 %v2207_v58  ;;  %2894 = vmatpush3.msra.mxu1 %v2239_v59  ;;  %v2307_v5 = vld [vmem:[#allocation7 + $0x360] sm:$0xff]  ;;  %v2322_v7 = vld [vmem:[#allocation7 + $0x3d8] sm:$0xff] }
0x189a   :  { %2857 = vmatprep.subr.mxu0 %v2222_v60  ;;  %2895 = vmatprep.subr.mxu1 %v2254_v61  ;;  %v2274_v58 = vld [vmem:[#allocation7 + $0x258] sm:$0xff]  ;;  %v2289_v60 = vld [vmem:[#allocation7 + $0x2d0] sm:$0xff] }
0x189b   :  { %2858 = vmatpush3.msra.mxu0 %v2206_v62  ;;  %2896 = vmatpush3.msra.mxu1 %v2238_v63  ;;  %v2306_v59 = vld [vmem:[#allocation7 + $0x358] sm:$0xff]  ;;  %v2321_v61 = vld [vmem:[#allocation7 + $0x3d0] sm:$0xff] }
0x189c   :  { %2859 = vmatprep.subr.mxu0 %v2221_v2  ;;  %2897 = vmatprep.subr.mxu1 %v2253_v6  ;;  %v2273_v62 = vld [vmem:[#allocation7 + $0x250] sm:$0xff]  ;;  %v2288_v2 = vld [vmem:[#allocation7 + $0x2c8] sm:$0xff] }
0x189d   :  { %2860 = vmatpush3.msra.mxu0 %v2205_v8  ;;  %2898 = vmatpush3.msra.mxu1 %v2237_v10  ;;  %v2305_v63 = vld [vmem:[#allocation7 + $0x350] sm:$0xff]  ;;  %v2320_v6 = vld [vmem:[#allocation7 + $0x3c8] sm:$0xff] }
0x189e   :  { %2861 = vmatprep.subr.mxu0 %v2220_v11  ;;  %2899 = vmatprep.subr.mxu1 %v2252_v20  ;;  %v2272_v8 = vld [vmem:[#allocation7 + $0x248] sm:$0xff]  ;;  %v2287_v11 = vld [vmem:[#allocation7 + $0x2c0] sm:$0xff] }
0x189f   :  { %2862 = vmatpush3.msra.mxu0 %v2204_v14  ;;  %2900 = vmatpush3.msra.mxu1 %v2236_v15  ;;  %v2304_v10 = vld [vmem:[#allocation7 + $0x348] sm:$0xff]  ;;  %v2319_v20 = vld [vmem:[#allocation7 + $0x3c0] sm:$0xff]  ;;  %v2286_v14 = vld [vmem:[#allocation7 + $0x2b8] sm:$0xff] }
0x18a0   :  { %2863 = vmatprep.subr.mxu0 %v2219_v16  ;;  %2901 = vmatprep.subr.mxu1 %v2251_v17  ;;  %v2318_v15 = vld [vmem:[#allocation7 + $0x3b8] sm:$0xff] }
0x18a1   :  { %2864 = vmatpush3.msra.mxu0 %v2203_v18  ;;  %2902 = vmatpush3.msra.mxu1 %v2235_v19  ;;  %v2270_v16 = vld [vmem:[#allocation7 + $0x238] sm:$0xff]  ;;  %v2285_v18 = vld [vmem:[#allocation7 + $0x2b0] sm:$0xff] }
0x18a2   :  { %2865 = vmatprep.subr.mxu0 %v2218_v29  ;;  %2903 = vmatprep.subr.mxu1 %v2250_v32  ;;  %v2302_v17 = vld [vmem:[#allocation7 + $0x338] sm:$0xff]  ;;  %v2317_v19 = vld [vmem:[#allocation7 + $0x3b0] sm:$0xff] }
0x18a3   :  { %2866 = vmatpush3.msra.mxu0 %v2202_v40  ;;  %2904 = vmatpush3.msra.mxu1 %v2234_v41  ;;  %v2269_v29 = vld [vmem:[#allocation7 + $0x230] sm:$0xff]  ;;  %v2284_v40 = vld [vmem:[#allocation7 + $0x2a8] sm:$0xff] }
0x18a4   :  { %2867 = vmatprep.subr.mxu0 %v2217_v42  ;;  %2905 = vmatprep.subr.mxu1 %v2249_v43  ;;  %v2301_v32 = vld [vmem:[#allocation7 + $0x330] sm:$0xff]  ;;  %v2316_v41 = vld [vmem:[#allocation7 + $0x3a8] sm:$0xff] }
0x18a5   :  { %2868 = vmatpush3.msra.mxu0 %v2201_v44  ;;  %2906 = vmatpush3.msra.mxu1 %v2233_v45  ;;  %v2268_v42 = vld [vmem:[#allocation7 + $0x228] sm:$0xff]  ;;  %v2283_v44 = vld [vmem:[#allocation7 + $0x2a0] sm:$0xff] }
0x18a6   :  { %2869 = vmatprep.subr.mxu0 %v2216_v0  ;;  %2907 = vmatprep.subr.mxu1 %v2248_v46  ;;  %v2300_v43 = vld [vmem:[#allocation7 + $0x328] sm:$0xff]  ;;  %v2315_v45 = vld [vmem:[#allocation7 + $0x3a0] sm:$0xff] }
0x18a7   :  { %2870 = vmatpush3.msra.mxu0 %v2200_v49  ;;  %2908 = vmatpush3.msra.mxu1 %v2232_v35  ;;  %v2267_v0 = vld [vmem:[#allocation7 + $0x220] sm:$0xff]  ;;  %v2266_v49 = vld [vmem:[#allocation7 + $0x218] sm:$0xff] }
0x18a8   :  { %2871 = vmatprep.subr.mxu0 %v2215_v50  ;;  %2909 = vmatprep.subr.mxu1 %v2247_v51  ;;  %v2299_v46 = vld [vmem:[#allocation7 + $0x320] sm:$0xff]  ;;  %v2298_v35 = vld [vmem:[#allocation7 + $0x318] sm:$0xff]  ;;  %v2281_v50 = vld [vmem:[#allocation7 + $0x290] sm:$0xff] }
0x18a9   :  { %2872 = vmatpush3.msra.mxu0 %v2199_v52  ;;  %2910 = vmatpush3.msra.mxu1 %v2231_v53  ;;  %v2313_v51 = vld [vmem:[#allocation7 + $0x390] sm:$0xff] }
0x18aa   :  { %2399 = vmatmul.mubr.f32.vlgmr.msra.gmra.mxu0 %v2183_v54  ;;  %2474 = vmatmul.mubr.f32.vlgmr.msra.gmra.mxu1 %v2185_v55  ;;  %v2265_v52 = vld [vmem:[#allocation7 + $0x210] sm:$0xff]  ;;  %v2280_v54 = vld [vmem:[#allocation7 + $0x288] sm:$0xff] }
0x18ab   :  { %2917 = vmatprep.subr.mxu0 %v2294_v33  ;;  %2955 = vmatprep.subr.mxu1 %v2326_v38  ;;  %v2297_v53 = vld [vmem:[#allocation7 + $0x310] sm:$0xff]  ;;  %v2312_v55 = vld [vmem:[#allocation7 + $0x388] sm:$0xff] }
0x18ac   :  { %2918 = vmatpush3.msra.mxu0 %v2278_v56  ;;  %2956 = vmatpush3.msra.mxu1 %v2310_v21  ;;  %v2264_v33 = vld [vmem:[#allocation7 + $0x208] sm:$0xff]  ;;  %v2279_v56 = vld [vmem:[#allocation7 + $0x280] sm:$0xff] }
0x18ad   :  { %2919 = vmatprep.subr.mxu0 %v2293_v22  ;;  %2957 = vmatprep.subr.mxu1 %v2325_v24  ;;  %v2296_v38 = vld [vmem:[#allocation7 + $0x308] sm:$0xff]  ;;  %v2311_v21 = vld [vmem:[#allocation7 + $0x380] sm:$0xff] }
0x18ae   :  { %2920 = vmatpush3.msra.mxu0 %v2277_v23  ;;  %2958 = vmatpush3.msra.mxu1 %v2309_v25  ;;  %v2263_v22 = vld [vmem:[#allocation7 + $0x200] sm:$0xff]  ;;  %v1843_v25 = vsub.s32 4, %v3845_v30 }
0x18af   :  { %2921 = vmatprep.subr.mxu0 %v2292_v26  ;;  %2959 = vmatprep.subr.mxu1 %v2324_v27  ;;  %v2295_v24 = vld [vmem:[#allocation7 + $0x300] sm:$0xff]  ;;  %v1851_v26 = vsub.s32 6, %v3845_v30  ;;  %v1847_v27 = vsub.s32 5, %v3845_v30 }
0x18b0   :  { %2922 = vmatpush3.msra.mxu0 %v2276_v28  ;;  %2960 = vmatpush3.msra.mxu1 %v2308_v1  ;;  %v2662_v23 = vld [vmem:[%s3976_s11 + $0x78] sm:$0xff]  ;;  %v1855_v28 = vsub.s32 7, %v3845_v30 }
0x18b1   :  { %2923 = vmatprep.subr.mxu0 %v2291_v3  ;;  %2961 = vmatprep.subr.mxu1 %v2323_v4 }
0x18b2   :  { %2924 = vmatpush3.msra.mxu0 %v2275_v57  ;;  %2962 = vmatpush3.msra.mxu1 %v2307_v5  ;;  %v1856_v30 = vrot.slane %v3858_v34, %v1855_v28 }
0x18b3   :  { %2925 = vmatprep.subr.mxu0 %v2290_v31  ;;  %2963 = vmatprep.subr.mxu1 %v2322_v7  ;;  %v1844_v7 = vrot.slane %v3858_v34, %v1843_v25  ;;  %v2798_v25 = vld [vmem:[%s3974_s9] ss:$0 sm:$0xff] }
0x18b4   :  { %2926 = vmatpush3.msra.mxu0 %v2274_v58  ;;  %2964 = vmatpush3.msra.mxu1 %v2306_v59  ;;  %v1852_v58 = vrot.slane %v3858_v34, %v1851_v26 }
0x18b5   :  { %2927 = vmatprep.subr.mxu0 %v2289_v60  ;;  %2965 = vmatprep.subr.mxu1 %v2321_v61  ;;  %v1848_v61 = vrot.slane %v3858_v34, %v1847_v27 }
0x18b6   :  { %2928 = vmatpush3.msra.mxu0 %v2273_v62  ;;  %2966 = vmatpush3.msra.mxu1 %v2305_v63 }
0x18b7   :  { %2929 = vmatprep.subr.mxu0 %v2288_v2  ;;  %2967 = vmatprep.subr.mxu1 %v2320_v6 }
0x18b8   :  { %2930 = vmatpush3.msra.mxu0 %v2272_v8  ;;  %2968 = vmatpush3.msra.mxu1 %v2304_v10 }
0x18b9   :  { %2931 = vmatprep.subr.mxu0 %v2287_v11  ;;  %2969 = vmatprep.subr.mxu1 %v2319_v20 }
0x18ba   :  { %2932 = vmatpush3.msra.mxu0 %v2271_v12  ;;  %2970 = vmatpush3.msra.mxu1 %v2303_v13 }
0x18bb   :  { %2933 = vmatprep.subr.mxu0 %v2286_v14  ;;  %2971 = vmatprep.subr.mxu1 %v2318_v15 }
0x18bc   :  { %2934 = vmatpush3.msra.mxu0 %v2270_v16  ;;  %2972 = vmatpush3.msra.mxu1 %v2302_v17  ;;  %v2661_v17 = vld [vmem:[%s3976_s11 + $0x70] sm:$0xff] }
0x18bd   :  { %2935 = vmatprep.subr.mxu0 %v2285_v18  ;;  %2973 = vmatprep.subr.mxu1 %v2317_v19 }
0x18be   :  { %2936 = vmatpush3.msra.mxu0 %v2269_v29  ;;  %2974 = vmatpush3.msra.mxu1 %v2301_v32 }
0x18bf   :  { %2937 = vmatprep.subr.mxu0 %v2284_v40  ;;  %2975 = vmatprep.subr.mxu1 %v2316_v41 }
0x18c0   :  { %2938 = vmatpush3.msra.mxu0 %v2268_v42  ;;  %2976 = vmatpush3.msra.mxu1 %v2300_v43  ;;  %v2660_v42 = vld [vmem:[%s3976_s11 + $0x68] sm:$0xff] }
0x18c1   :  { %2939 = vmatprep.subr.mxu0 %v2283_v44  ;;  %2977 = vmatprep.subr.mxu1 %v2315_v45 }
0x18c2   :  { %2940 = vmatpush3.msra.mxu0 %v2267_v0  ;;  %2978 = vmatpush3.msra.mxu1 %v2299_v46  ;;  %v2659_v46 = vld [vmem:[%s3976_s11 + $0x60] sm:$0xff] }
0x18c3   :  { %2941 = vmatprep.subr.mxu0 %v2282_v47  ;;  %2979 = vmatprep.subr.mxu1 %v2314_v48  ;;  %v2658_v47 = vld [vmem:[%s3976_s11 + $0x58] sm:$0xff]  ;;  %v2657_v48 = vld [vmem:[%s3976_s11 + $0x50] sm:$0xff] }
0x18c4   :  { %2942 = vmatpush3.msra.mxu0 %v2266_v49  ;;  %2980 = vmatpush3.msra.mxu1 %v2298_v35  ;;  %v2656_v49 = vld [vmem:[%s3976_s11 + $0x48] sm:$0xff]  ;;  %v2655_v35 = vld [vmem:[%s3976_s11 + $0x40] sm:$0xff] }
0x18c5   :  { %2943 = vmatprep.subr.mxu0 %v2281_v50  ;;  %2981 = vmatprep.subr.mxu1 %v2313_v51  ;;  %v2654_v50 = vld [vmem:[%s3976_s11 + $0x38] sm:$0xff]  ;;  %v2653_v51 = vld [vmem:[%s3976_s11 + $0x30] sm:$0xff] }
0x18c6   :  { %2944 = vmatpush3.msra.mxu0 %v2265_v52  ;;  %2982 = vmatpush3.msra.mxu1 %v2297_v53  ;;  %v2652_v52 = vld [vmem:[%s3976_s11 + $0x28] sm:$0xff]  ;;  %v2651_v53 = vld [vmem:[%s3976_s11 + $0x20] sm:$0xff] }
0x18c7   :  { %2945 = vmatprep.subr.mxu0 %v2280_v54  ;;  %2983 = vmatprep.subr.mxu1 %v2312_v55  ;;  %v2650_v54 = vld [vmem:[%s3976_s11 + $0x18] sm:$0xff]  ;;  %v2649_v55 = vld [vmem:[%s3976_s11 + $0x10] sm:$0xff] }
0x18c8   :  { %2946 = vmatpush3.msra.mxu0 %v2264_v33  ;;  %2984 = vmatpush3.msra.mxu1 %v2296_v38  ;;  %v2648_v33 = vld [vmem:[%s3976_s11 + $0x8] sm:$0xff]  ;;  %v2647_v38 = vld [vmem:[%s3976_s11] sm:$0xff] }
0x18c9   :  { %2947 = vmatprep.subr.mxu0 %v2279_v56  ;;  %2985 = vmatprep.subr.mxu1 %v2311_v21 }
0x18ca   :  { %2948 = vmatpush3.msra.mxu0 %v2263_v22  ;;  %2986 = vmatpush3.msra.mxu1 %v2295_v24 }
0x18cb   :  { %3097 = vmatprep.subr.mxu0 %v2662_v23 }
0x1943   :  { %v1947_v1 = vpop.f32.mrf.mxu0  ;;  %v2024_v3 = vpop.f32.mrf.mxu1 }
0x1944   :  { %v1948_v4 = vadd.f32 %v1947_v1, %v3881_v36  ;;  %v2025_v57 = vadd.f32 %v2024_v3, %v3884_v37 }
0x1945   :  { %v1949_v5 = vpop.f32.mrf.mxu0  ;;  %v2026_v31 = vpop.f32.mrf.mxu1 }
0x1946   :  { %v1950_v59 = vadd.f32 %v1949_v5, %v3863_v39  ;;  %v2027_v60 = vadd.f32 %v2026_v31, %v3866_v9  ;;  %v2191_v6 = vmax.f32 %v1948_v4, 0.0  ;;  %v2193_v37 = vmax.f32 %v2025_v57, 0.0 }
0x1947   :  { %v2095_v62 = vpop.f32.mrf.mxu0  ;;  %v2172_v63 = vpop.f32.mrf.mxu1 }
0x1948   :  { %v2192_v2 = vmax.f32 %v1950_v59, 0.0  ;;  %v2194_v36 = vmax.f32 %v2027_v60, 0.0  ;;  %v2096_v8 = vadd.f32 %v2095_v62, %v1844_v7  ;;  %v2173_v10 = vadd.f32 %v2172_v63, %v1852_v58 }
0x1949   :  { %v2097_v11 = vpop.f32.mrf.mxu0  ;;  %v2174_v20 = vpop.f32.mrf.mxu1 }
0x194a   :  { %v2098_v12 = vadd.f32 %v2097_v11, %v1848_v61  ;;  %v2175_v13 = vadd.f32 %v2174_v20, %v1856_v30  ;;  %2403 = vmatprep.mubr.f32.mxu0 %v2192_v2  ;;  %2478 = vmatprep.mubr.f32.mxu1 %v2194_v36  ;;  %v2187_v14 = vmax.f32 %v2096_v8, 0.0  ;;  %v2189_v34 = vmax.f32 %v2173_v10, 0.0  ;;  %v2799_v10 = vld [vmem:[%s3975_s10] ss:$0 sm:$0xff] }
0x194b   :  { %2404 = vmatmul.mubr.f32.gmra.mxu0 %v2191_v6  ;;  %2479 = vmatmul.mubr.f32.gmra.mxu1 %v2193_v37 }
0x194c   :  { %v2188_v39 = vmax.f32 %v2098_v12, 0.0  ;;  %v2190_v9 = vmax.f32 %v2175_v13, 0.0 }
0x194d   :  { %v2101_v15 = vpop.f32.mrf.mxu0  ;;  %v2178_v16 = vpop.f32.mrf.mxu1 }
0x194e   :  { %2548 = vmatprep.mubr.f32.mxu0 %v2188_v39  ;;  %2623 = vmatprep.mubr.f32.mxu1 %v2190_v9  ;;  %v2102_v18 = vadd.f32 %v2101_v15, %v1844_v7  ;;  %v2179_v19 = vadd.f32 %v2178_v16, %v1852_v58 }
0x194f   :  { %v2103_v29 = vpop.f32.mrf.mxu0  ;;  %v2180_v32 = vpop.f32.mrf.mxu1  ;;  %2549 = vmatmul.mubr.f32.vlgmr.msra.gmra.mxu0 %v2187_v14  ;;  %2624 = vmatmul.mubr.f32.vlgmr.msra.gmra.mxu1 %v2189_v34 }
0x1950   :  { %v2104_v40 = vadd.f32 %v2103_v29, %v1848_v61  ;;  %v2181_v41 = vadd.f32 %v2180_v32, %v1856_v30  ;;  %3098 = vmatpush3.msra.mxu0 %v2662_v23  ;;  %v2195_v45 = vmax.f32 %v2102_v18, 0.0  ;;  %v2197_v0 = vmax.f32 %v2179_v19, 0.0  ;;  %v2800_v18 = vld [vmem:[%s3977_s12] ss:$0 sm:$0xff] }
0x1951   :  { %3099 = vmatprep.subr.mxu0 %v2661_v17 }
0x1952   :  { %v2196_v43 = vmax.f32 %v2104_v40, 0.0  ;;  %v2198_v44 = vmax.f32 %v2181_v41, 0.0  ;;  %3100 = vmatpush3.msra.mxu0 %v2661_v17 }
0x1953   :  { %3101 = vmatprep.subr.mxu0 %v2660_v42 }
0x1954   :  { %2553 = vmatprep.mubr.f32.mxu0 %v2196_v43  ;;  %2628 = vmatprep.mubr.f32.mxu1 %v2198_v44 }
0x1955   :  { %2554 = vmatmul.mubr.f32.gmra.mxu0 %v2195_v45  ;;  %2629 = vmatmul.mubr.f32.gmra.mxu1 %v2197_v0 }
0x1956   :  { %3102 = vmatpush3.msra.mxu0 %v2660_v42 }
0x1957   :  { %3103 = vmatprep.subr.mxu0 %v2659_v46 }
0x1958   :  { %3104 = vmatpush3.msra.mxu0 %v2659_v46 }
0x1959   :  { %3105 = vmatprep.subr.mxu0 %v2658_v47 }
0x195a   :  { %3106 = vmatpush3.msra.mxu0 %v2658_v47 }
0x195b   :  { %3107 = vmatprep.subr.mxu0 %v2657_v48 }
0x195c   :  { %3108 = vmatpush3.msra.mxu0 %v2657_v48 }
0x195d   :  { %3109 = vmatprep.subr.mxu0 %v2656_v49 }
0x195e   :  { %3110 = vmatpush3.msra.mxu0 %v2656_v49 }
0x195f   :  { %3111 = vmatprep.subr.mxu0 %v2655_v35 }
0x1960   :  { %3112 = vmatpush3.msra.mxu0 %v2655_v35 }
0x1961   :  { %3113 = vmatprep.subr.mxu0 %v2654_v50 }
0x1962   :  { %3114 = vmatpush3.msra.mxu0 %v2654_v50 }
0x1963   :  { %3115 = vmatprep.subr.mxu0 %v2653_v51 }
0x1964   :  { %3116 = vmatpush3.msra.mxu0 %v2653_v51 }
0x1965   :  { %3117 = vmatprep.subr.mxu0 %v2652_v52 }
0x1966   :  { %3118 = vmatpush3.msra.mxu0 %v2652_v52 }
0x1967   :  { %3119 = vmatprep.subr.mxu0 %v2651_v53 }
0x1968   :  { %3120 = vmatpush3.msra.mxu0 %v2651_v53 }
0x1969   :  { %3121 = vmatprep.subr.mxu0 %v2650_v54 }
0x196a   :  { %3122 = vmatpush3.msra.mxu0 %v2650_v54  ;;  %v2873_v56 = vpop.f32.mrf.mxu0  ;;  %v2911_v21 = vpop.f32.mrf.mxu1 }
0x196b   :  { %3123 = vmatprep.subr.mxu0 %v2649_v55 }
0x196c   :  { %3124 = vmatpush3.msra.mxu0 %v2649_v55  ;;  %v2874_v22 = vpop.f32.mrf.mxu0  ;;  %v2912_v24 = vpop.f32.mrf.mxu1 }
0x196d   :  { %3125 = vmatprep.subr.mxu0 %v2648_v33  ;;  %v2875_v23 = vadd.f32 %v2874_v22, %v2873_v56  ;;  %v2913_v5 = vadd.f32 %v2912_v24, %v2911_v21 }
0x196e   :  { %3126 = vmatpush3.msra.mxu0 %v2648_v33 }
0x196f   :  { %3127 = vmatprep.subr.mxu0 %v2647_v38  ;;  %v2401_v3 = vadd.f32 %v2875_v23, %v2798_v25 }
0x1970   :  { %3128 = vmatpush3.msra.mxu0 %v2647_v38 }
0x1971   :  { %v2476_v59 = vadd.f32 %v2913_v5, %v2401_v3 }
0x1a0b   :  { %v2876_v26 = vpop.f32.mrf.mxu0  ;;  %v2914_v27 = vpop.f32.mrf.mxu1 }
0x1a0d   :  { %v2877_v28 = vpop.f32.mrf.mxu0  ;;  %v2915_v1 = vpop.f32.mrf.mxu1 }
0x1a0e   :  { %v2878_v31 = vadd.f32 %v2877_v28, %v2876_v26  ;;  %v2916_v36 = vadd.f32 %v2915_v1, %v2914_v27 }
0x1a0f   :  { %v2949_v4 = vpop.f32.mrf.mxu0  ;;  %v2987_v57 = vpop.f32.mrf.mxu1 }
0x1a10   :  { %v2406_v61 = vadd.f32 %v2878_v31, %v2798_v25 }
0x1a11   :  { %v2950_v7 = vpop.f32.mrf.mxu0  ;;  %v2988_v58 = vpop.f32.mrf.mxu1 }
0x1a12   :  { %v2951_v60 = vadd.f32 %v2950_v7, %v2949_v4  ;;  %v2989_v62 = vadd.f32 %v2988_v58, %v2987_v57  ;;  %v2481_v11 = vadd.f32 %v2916_v36, %v2406_v61 }
0x1a14   :  { %v2551_v30 = vadd.f32 %v2951_v60, %v2476_v59 }
0x1a15   :  { %v2952_v63 = vpop.f32.mrf.mxu0  ;;  %v2990_v2 = vpop.f32.mrf.mxu1 }
0x1a16   :  { %v2626_v6 = vadd.f32 %v2989_v62, %v2551_v30 }
0x1a17   :  { %v2953_v37 = vpop.f32.mrf.mxu0  ;;  %v2991_v8 = vpop.f32.mrf.mxu1 }
0x1a18   :  { %v2635_v20 = vmin.f32 %v2626_v6, 0.0  ;;  %v2954_v12 = vadd.f32 %v2953_v37, %v2952_v63  ;;  %v2992_v39 = vadd.f32 %v2991_v8, %v2990_v2 }
0x1a1a   :  { %v2556_v13 = vadd.f32 %v2954_v12, %v2481_v11  ;;  %v2643_v9 = vmul.f32 %v2799_v10, %v2635_v20 }
0x1a1c   :  { %v2631_v14 = vadd.f32 %v2992_v39, %v2556_v13  ;;  %v2645_v34 = vsub.f32 %v2626_v6, %v2643_v9 }
0x1a1e   :  { %v2636_v15 = vmin.f32 %v2631_v14, 0.0  ;;  %3129 = vmatprep.mubr.f32.mxu0 %v2645_v34 }
0x1a20   :  { %v2644_v16 = vmul.f32 %v2799_v10, %v2636_v15 }
0x1a22   :  { %v2646_v17 = vsub.f32 %v2631_v14, %v2644_v16 }
0x1a24   :  { %3130 = vmatmul.mubr.f32.vlgmr.msra.gmra.mxu0 %v2646_v17 }
0x1ae4   :  { %v3131_v19 = vpop.f32.mrf.mxu0 }
0x1ae5   :  { %v2742_v29 = vadd.f32 %v3131_v19, %v2800_v18 }
0x1ae6   :  { %v2736_v32 = vpop.f32.mrf.mxu0 }
0x1ae7   :  { %2746 = vst [vmem:[%s3978_s13 + $0x8] sm:$0xff] %v2742_v29  ;;  %v2737_v40 = vadd.f32 %v2800_v18, %v2736_v32 }
0x1ae9   :  { %2745 = vst [vmem:[%s3978_s13] sm:$0xff] %v2737_v40 }
0x1aea   :  { %2751 = vsyncpa [#allocation3], 1 }
0x1aeb   :  { %2752 = vsyncpa [#allocation5], 1 }
0x1aec   :  { %2753 = vsyncpa [#allocation8], 1 }

</bundles_post_ra>
